<compile_context>
chip_gen: v7x
topology: tpu7x:2x2x1
jax: 0.10.0
libtpu: 0.0.40
codegen_flags: <defaults>
</compile_context>

<pallas_src>
import functools

import jax
import jax.numpy as jnp
import numpy as np
from jax.experimental import pallas as pl
from jax.experimental.pallas import tpu as pltpu


# ---------------------------------------------------------------------------
# Pallas kernel
# ---------------------------------------------------------------------------
def _make_actor_lstm_kernel(num_layers: int, hidden: int, seq_len: int, batch: int):
    """Kernel factory (all sizes static)."""
    H, T, B = hidden, seq_len, batch
    BT = B * T

    def kernel(*refs):
        # refs: x | (w_ih_T, w_hh_T, b) * L | w_mean_T, b_mean | mean_out
        #       | z_scr, h_all_scr
        x_ref = refs[0]
        idx = 1
        layer_refs = []
        for _ in range(num_layers):
            layer_refs.append((refs[idx], refs[idx + 1], refs[idx + 2]))
            idx += 3
        w_mean_ref, b_mean_ref = refs[idx], refs[idx + 1]
        mean_ref = refs[idx + 2]
        z_scr = refs[idx + 3]       # (B, T, 4H)  hoisted input projections
        h_all_scr = refs[idx + 4]   # (B, T, H)   per-layer outputs over all t

        # Lane mask selecting the g-gate region (tanh) of the 4H gate vector.
        # Hoisted once: shared by every layer and timestep.
        lane = jax.lax.broadcasted_iota(jnp.int32, (B, 4 * H), 1)
        g_mask = (lane >= 2 * H) & (lane < 3 * H)

        x_flat = x_ref[...].reshape(BT, -1)   # (B*T, D), tile-aligned relabel

        for l, (w_ih_ref, w_hh_ref, b_ref) in enumerate(layer_refs):
            w_ih = w_ih_ref[...]    # (in_dim, 4H)
            w_hh = w_hh_ref[...]    # (H, 4H)
            b = b_ref[...]          # (1, 4H) = b_ih + b_hh

            # --- Hoisted input projection over ALL timesteps in one matmul
            #     (off the serial recurrence path).
            xin = x_flat if l == 0 else h_all_scr[...].reshape(BT, H)
            z = jnp.dot(xin, w_ih, preferred_element_type=jnp.float32) + b
            z_scr[...] = z.reshape(B, T, 4 * H)

            # --- Serial recurrence: only h_prev @ W_hh^T + elementwise/step.
            h = jnp.zeros((B, H), jnp.float32)
            c = jnp.zeros((B, H), jnp.float32)
            for t in range(T):  # static, fully unrolled
                if t == 0:
                    # h0 == 0 -> recurrent matmul contributes nothing.
                    gates = z_scr[:, 0, :]
                else:
                    gates = z_scr[:, t, :] + jnp.dot(
                        h, w_hh, preferred_element_type=jnp.float32
                    )  # (B, 4H), PyTorch gate order i, f, g, o

                # One sigmoid + one tanh over the full 128-lane gate vector,
                # select the tanh region (g gate) with the hoisted lane mask.
                sig = jax.nn.sigmoid(gates)
                tnh = jnp.tanh(gates)
                act = jnp.where(g_mask, tnh, sig)

                i_g = act[:, 0 * H:1 * H]
                f_g = act[:, 1 * H:2 * H]
                g_g = act[:, 2 * H:3 * H]
                o_g = act[:, 3 * H:4 * H]

                c = i_g * g_g if t == 0 else f_g * c + i_g * g_g
                h = o_g * jnp.tanh(c)
                h_all_scr[:, t, :] = h   # this layer's output at step t

        # --- Mean head hoisted out of the time loop: one matmul over all
        #     (B*T) rows and a single whole-block output store.
        w_m = w_mean_ref[...]   # (H, A)
        b_m = b_mean_ref[...]   # (1, A)
        out = jnp.tanh(
            jnp.dot(h_all_scr[...].reshape(BT, H), w_m,
                    preferred_element_type=jnp.float32) + b_m
        )
        mean_ref[...] = out.reshape(B, T, -1).astype(mean_ref.dtype)

    return kernel


# ---------------------------------------------------------------------------
# Wrapper
# ---------------------------------------------------------------------------
@functools.partial(jax.jit, static_argnames=("num_layers", "hidden"))
def actor_lstm_forward(s_btd, params, *, num_layers, hidden):
    """s_btd: (B, T, D) float32, batch_first like PyTorch. Returns (mean, std)."""
    B, T, D = s_btd.shape
    A = params["w_mean"].shape[0]
    H = hidden

    # No input/output transposes: kernel consumes (B,T,D), emits (B,T,A).
    kernel_inputs = [s_btd]
    in_specs = [pl.BlockSpec((B, T, D), lambda i: (0, 0, 0))]
    for l in range(num_layers):
        w_ih_t = params["lstm"][l]["w_ih"].T          # (in_dim, 4H)
        w_hh_t = params["lstm"][l]["w_hh"].T          # (H, 4H)
        b_sum = (params["lstm"][l]["b_ih"] + params["lstm"][l]["b_hh"])[None, :]  # (1, 4H)
        kernel_inputs += [w_ih_t, w_hh_t, b_sum]
        in_specs += [
            pl.BlockSpec(w_ih_t.shape, lambda i: (0, 0)),
            pl.BlockSpec(w_hh_t.shape, lambda i: (0, 0)),
            pl.BlockSpec(b_sum.shape, lambda i: (0, 0)),
        ]
    w_mean_t = params["w_mean"].T                     # (H, A)
    b_mean = params["b_mean"][None, :]                # (1, A)
    kernel_inputs += [w_mean_t, b_mean]
    in_specs += [
        pl.BlockSpec(w_mean_t.shape, lambda i: (0, 0)),
        pl.BlockSpec(b_mean.shape, lambda i: (0, 0)),
    ]

    mean = pl.pallas_call(
        _make_actor_lstm_kernel(num_layers, H, T, B),
        out_shape=jax.ShapeDtypeStruct((B, T, A), jnp.float32),
        grid_spec=pltpu.PrefetchScalarGridSpec(
            num_scalar_prefetch=0,
            grid=(1,),                     # single invocation; time loop is in-kernel
            in_specs=in_specs,
            out_specs=pl.BlockSpec((B, T, A), lambda i: (0, 0, 0)),
            scratch_shapes=[
                pltpu.VMEM((B, T, 4 * H), jnp.float32),  # hoisted input projections
                pltpu.VMEM((B, T, H), jnp.float32),      # per-layer outputs over all t
            ],
        ),
        compiler_params=pltpu.CompilerParams(
            dimension_semantics=("arbitrary",),
        ),
    )(*kernel_inputs)

    # std = exp(log_std).expand_as(mean) — trivial broadcast, done in XLA.
    std = jnp.broadcast_to(jnp.exp(params["log_std"]), mean.shape)
    return mean, std


# ---------------------------------------------------------------------------
# Deterministic parameter initialization (mirrors PyTorch shapes / init style)
# ---------------------------------------------------------------------------
def init_params(key, state_dim, hidden, num_layers, action_dim):
    params = {"lstm": []}
    k = 1.0 / np.sqrt(hidden)
    for l in range(num_layers):
        in_dim = state_dim if l == 0 else hidden
        key, k1, k2, k3, k4 = jax.random.split(key, 5)
        params["lstm"].append(
            {
                "w_ih": jax.random.uniform(k1, (4 * hidden, in_dim), jnp.float32, -k, k),
                "w_hh": jax.random.uniform(k2, (4 * hidden, hidden), jnp.float32, -k, k),
                "b_ih": jax.random.uniform(k3, (4 * hidden,), jnp.float32, -k, k),
                "b_hh": jax.random.uniform(k4, (4 * hidden,), jnp.float32, -k, k),
            }
        )
    key, km = jax.random.split(key)
    # orthogonal_init(mean_layer, gain=0.01), bias = 0
    params["w_mean"] = jax.nn.initializers.orthogonal(scale=0.01)(
        km, (action_dim, hidden), jnp.float32
    )
    params["b_mean"] = jnp.zeros((action_dim,), jnp.float32)
    # args.std falsy -> log_std = zeros(1, action_dim)
    params["log_std"] = jnp.zeros((1, action_dim), jnp.float32)
    return params


# ---------------------------------------------------------------------------
# Pure-JAX reference (for correctness check)
# ---------------------------------------------------------------------------
def reference_forward(s, params, num_layers, hidden):
    B, T, D = s.shape
    H = hidden
    h = jnp.zeros((num_layers, B, H), jnp.float32)
    c = jnp.zeros((num_layers, B, H), jnp.float32)
    outs = []
    for t in range(T):
        inp = s[:, t, :]
        new_h, new_c = [], []
        for l in range(num_layers):
            p = params["lstm"][l]
            gates = inp @ p["w_ih"].T + h[l] @ p["w_hh"].T + p["b_ih"] + p["b_hh"]
            i_g = jax.nn.sigmoid(gates[:, 0 * H:1 * H])
            f_g = jax.nn.sigmoid(gates[:, 1 * H:2 * H])
            g_g = jnp.tanh(gates[:, 2 * H:3 * H])
            o_g = jax.nn.sigmoid(gates[:, 3 * H:4 * H])
            c_l = f_g * c[l] + i_g * g_g
            h_l = o_g * jnp.tanh(c_l)
            new_h.append(h_l)
            new_c.append(c_l)
            inp = h_l
        h = jnp.stack(new_h)
        c = jnp.stack(new_c)
        outs.append(inp)
    out = jnp.stack(outs, axis=1)  # (B, T, H)
    mean = jnp.tanh(out @ params["w_mean"].T + params["b_mean"])
    std = jnp.broadcast_to(jnp.exp(params["log_std"]), mean.shape)
    return mean, std


# ---------------------------------------------------------------------------
if __name__ == "__main__":
    # args: state_dim=16, lstm_hidden_dim=32, lstm_num_layers=2, action_dim=4,
    #       std=None, use_orthogonal_init=True
    B, T, D, H, L, A = 2, 8, 16, 32, 2, 4

    key = jax.random.PRNGKey(0)
    key, kp, kx = jax.random.split(key, 3)
    params = init_params(kp, state_dim=D, hidden=H, num_layers=L, action_dim=A)
    s = jax.random.normal(kx, (B, T, D), jnp.float32)

    mean, std = actor_lstm_forward(s, params, num_layers=L, hidden=H)
    jax.block_until_ready((mean, std))

    mean_ref, std_ref = reference_forward(s, params, L, H)
    np.testing.assert_allclose(np.asarray(mean), np.asarray(mean_ref), rtol=1e-5, atol=1e-5)
    np.testing.assert_allclose(np.asarray(std), np.asarray(std_ref), rtol=1e-6, atol=1e-6)
    assert mean.shape == (B, T, A) and std.shape == (B, T, A)

    # TODO(synk): PyTorch module carries hidden/cell state across calls via
    # reset_hidden_state(); here we always start from the zero state (the
    # state produced inside the kernel is not returned).
    print("KERNEL_OK")
</pallas_src>

<mosaic_0001>
module attributes {stable_mosaic.version = 11 : i64} {
  func.func @kernel(%arg0: i32, %arg1: memref<2x8x16xf32, #tpu.memory_space<vmem>>, %arg2: memref<16x128xf32, #tpu.memory_space<vmem>>, %arg3: memref<32x128xf32, #tpu.memory_space<vmem>>, %arg4: memref<1x128xf32, #tpu.memory_space<vmem>>, %arg5: memref<32x128xf32, #tpu.memory_space<vmem>>, %arg6: memref<32x128xf32, #tpu.memory_space<vmem>>, %arg7: memref<1x128xf32, #tpu.memory_space<vmem>>, %arg8: memref<32x4xf32, #tpu.memory_space<vmem>>, %arg9: memref<1x4xf32, #tpu.memory_space<vmem>>, %arg10: memref<2x8x4xf32, #tpu.memory_space<vmem>>, %arg11: memref<2x8x128xf32, #tpu.memory_space<vmem>>, %arg12: memref<2x8x32xf32, #tpu.memory_space<vmem>>) attributes {dimension_semantics = [#tpu.dimension_semantics<arbitrary>], iteration_bounds = array<i64: 1>, scalar_prefetch = 0 : i64, scratch_operands = 2 : i64, tpu.core_type = #tpu.core_type<tc>, window_params = [{pipeline_mode = #tpu.pipeline_mode<synchronous>, transform_indices = @transform_0, window_bounds = array<i64: 2, 8, 16>}, {pipeline_mode = #tpu.pipeline_mode<synchronous>, transform_indices = @transform_1, window_bounds = array<i64: 16, 128>}, {pipeline_mode = #tpu.pipeline_mode<synchronous>, transform_indices = @transform_2, window_bounds = array<i64: 32, 128>}, {pipeline_mode = #tpu.pipeline_mode<synchronous>, transform_indices = @transform_3, window_bounds = array<i64: 1, 128>}, {pipeline_mode = #tpu.pipeline_mode<synchronous>, transform_indices = @transform_4, window_bounds = array<i64: 32, 128>}, {pipeline_mode = #tpu.pipeline_mode<synchronous>, transform_indices = @transform_5, window_bounds = array<i64: 32, 128>}, {pipeline_mode = #tpu.pipeline_mode<synchronous>, transform_indices = @transform_6, window_bounds = array<i64: 1, 128>}, {pipeline_mode = #tpu.pipeline_mode<synchronous>, transform_indices = @transform_7, window_bounds = array<i64: 32, 4>}, {pipeline_mode = #tpu.pipeline_mode<synchronous>, transform_indices = @transform_8, window_bounds = array<i64: 1, 4>}, {pipeline_mode = #tpu.pipeline_mode<synchronous>, transform_indices = @transform_9, window_bounds = array<i64: 2, 8, 4>}]} {
    %0 = tpu.iota {dimensions = array<i32: 1>} : vector<2x128xi32>
    %c64_i32 = arith.constant 64 : i32
    %1 = vector.broadcast %c64_i32 : i32 to vector<2x128xi32>
    %2 = arith.cmpi sge, %0, %1 : vector<2x128xi32>
    %c96_i32 = arith.constant 96 : i32
    %3 = vector.broadcast %c96_i32 : i32 to vector<2x128xi32>
    %4 = arith.cmpi slt, %0, %3 : vector<2x128xi32>
    %5 = arith.andi %2, %4 : vector<2x128xi1>
    %c0 = arith.constant 0 : index
    %c0_0 = arith.constant 0 : index
    %c0_1 = arith.constant 0 : index
    %6 = vector.load %arg1[%c0, %c0_0, %c0_1] : memref<2x8x16xf32, #tpu.memory_space<vmem>>, vector<2x8x16xf32>
    %7 = vector.shape_cast %6 : vector<2x8x16xf32> to vector<16x16xf32>
    %c0_2 = arith.constant 0 : index
    %c0_3 = arith.constant 0 : index
    %8 = vector.load %arg2[%c0_2, %c0_3] : memref<16x128xf32, #tpu.memory_space<vmem>>, vector<16x128xf32>
    %c0_4 = arith.constant 0 : index
    %c0_5 = arith.constant 0 : index
    %9 = vector.load %arg3[%c0_4, %c0_5] : memref<32x128xf32, #tpu.memory_space<vmem>>, vector<32x128xf32>
    %c0_6 = arith.constant 0 : index
    %c0_7 = arith.constant 0 : index
    %10 = vector.load %arg4[%c0_6, %c0_7] : memref<1x128xf32, #tpu.memory_space<vmem>>, vector<1x128xf32>
    %cst = arith.constant dense<0.000000e+00> : vector<16x128xf32>
    %11 = tpu.matmul %7, %8, %cst {dimension_numbers = #tpu.dot_dimension_numbers<[1], [0], [0], [1], [0, 0, 1, 1], [], []>} : vector<16x16xf32>, vector<16x128xf32>, vector<16x128xf32> -> vector<16x128xf32>
    %12 = vector.broadcast %10 : vector<1x128xf32> to vector<16x128xf32>
    %13 = arith.addf %11, %12 : vector<16x128xf32>
    %14 = vector.shape_cast %13 : vector<16x128xf32> to vector<2x8x128xf32>
    %c0_8 = arith.constant 0 : index
    %c0_9 = arith.constant 0 : index
    %c0_10 = arith.constant 0 : index
    %15 = vector.load %arg11[%c0_8, %c0_9, %c0_10] : memref<2x8x128xf32, #tpu.memory_space<vmem>>, vector<2x8x128xf32>
    tpu.vector_store %arg11[%c0_8, %c0_9, %c0_10], %14 {strides = array<i32>} : memref<2x8x128xf32, #tpu.memory_space<vmem>>, vector<2x8x128xf32>,
    %c0_11 = arith.constant 0 : index
    %c0_12 = arith.constant 0 : index
    %c0_13 = arith.constant 0 : index
    %16 = vector.load %arg11[%c0_11, %c0_12, %c0_13] : memref<2x8x128xf32, #tpu.memory_space<vmem>>, vector<2x1x128xf32>
    %17 = vector.shape_cast %16 : vector<2x1x128xf32> to vector<2x128xf32>
    %18 = arith.negf %17 : vector<2x128xf32>
    %19 = math.exp %18 : vector<2x128xf32>
    %cst_14 = arith.constant 1.000000e+00 : f32
    %20 = vector.broadcast %cst_14 : f32 to vector<2x128xf32>
    %21 = arith.addf %20, %19 : vector<2x128xf32>
    %22 = arith.divf %20, %21 : vector<2x128xf32>
    %23 = math.tanh %17 : vector<2x128xf32>
    %24 = arith.select %5, %23, %22 : vector<2x128xi1>, vector<2x128xf32>
    %25 = vector.extract_strided_slice %24 {offsets = [0, 0], sizes = [2, 32], strides = [1, 1]} : vector<2x128xf32> to vector<2x32xf32>
    %26 = vector.extract_strided_slice %24 {offsets = [0, 64], sizes = [2, 32], strides = [1, 1]} : vector<2x128xf32> to vector<2x32xf32>
    %27 = vector.extract_strided_slice %24 {offsets = [0, 96], sizes = [2, 32], strides = [1, 1]} : vector<2x128xf32> to vector<2x32xf32>
    %28 = arith.mulf %25, %26 : vector<2x32xf32>
    %29 = math.tanh %28 : vector<2x32xf32>
    %30 = arith.mulf %27, %29 : vector<2x32xf32>
    %c0_15 = arith.constant 0 : index
    %c0_16 = arith.constant 0 : index
    %c0_17 = arith.constant 0 : index
    %31 = vector.load %arg12[%c0_15, %c0_16, %c0_17] : memref<2x8x32xf32, #tpu.memory_space<vmem>>, vector<2x1x32xf32>
    %32 = vector.shape_cast %31 : vector<2x1x32xf32> to vector<2x32xf32>
    %33 = vector.shape_cast %30 : vector<2x32xf32> to vector<2x1x32xf32>
    tpu.vector_store %arg12[%c0_15, %c0_16, %c0_17], %33 {strides = array<i32>} : memref<2x8x32xf32, #tpu.memory_space<vmem>>, vector<2x1x32xf32>,
    %c0_18 = arith.constant 0 : index
    %c1 = arith.constant 1 : index
    %c0_19 = arith.constant 0 : index
    %34 = vector.load %arg11[%c0_18, %c1, %c0_19] : memref<2x8x128xf32, #tpu.memory_space<vmem>>, vector<2x1x128xf32>
    %35 = vector.shape_cast %34 : vector<2x1x128xf32> to vector<2x128xf32>
    %cst_20 = arith.constant dense<0.000000e+00> : vector<2x128xf32>
    %36 = tpu.matmul %30, %9, %cst_20 {dimension_numbers = #tpu.dot_dimension_numbers<[1], [0], [0], [1], [0, 0, 1, 1], [], []>} : vector<2x32xf32>, vector<32x128xf32>, vector<2x128xf32> -> vector<2x128xf32>
    %37 = arith.addf %35, %36 : vector<2x128xf32>
    %38 = arith.negf %37 : vector<2x128xf32>
    %39 = math.exp %38 : vector<2x128xf32>
    %cst_21 = arith.constant 1.000000e+00 : f32
    %40 = vector.broadcast %cst_21 : f32 to vector<2x128xf32>
    %41 = arith.addf %40, %39 : vector<2x128xf32>
    %42 = arith.divf %40, %41 : vector<2x128xf32>
    %43 = math.tanh %37 : vector<2x128xf32>
    %44 = arith.select %5, %43, %42 : vector<2x128xi1>, vector<2x128xf32>
    %45 = vector.extract_strided_slice %44 {offsets = [0, 0], sizes = [2, 32], strides = [1, 1]} : vector<2x128xf32> to vector<2x32xf32>
    %46 = vector.extract_strided_slice %44 {offsets = [0, 32], sizes = [2, 32], strides = [1, 1]} : vector<2x128xf32> to vector<2x32xf32>
    %47 = vector.extract_strided_slice %44 {offsets = [0, 64], sizes = [2, 32], strides = [1, 1]} : vector<2x128xf32> to vector<2x32xf32>
    %48 = vector.extract_strided_slice %44 {offsets = [0, 96], sizes = [2, 32], strides = [1, 1]} : vector<2x128xf32> to vector<2x32xf32>
    %49 = arith.mulf %46, %28 : vector<2x32xf32>
    %50 = arith.mulf %45, %47 : vector<2x32xf32>
    %51 = arith.addf %49, %50 : vector<2x32xf32>
    %52 = math.tanh %51 : vector<2x32xf32>
    %53 = arith.mulf %48, %52 : vector<2x32xf32>
    %c0_22 = arith.constant 0 : index
    %c1_23 = arith.constant 1 : index
    %c0_24 = arith.constant 0 : index
    %54 = vector.load %arg12[%c0_22, %c1_23, %c0_24] : memref<2x8x32xf32, #tpu.memory_space<vmem>>, vector<2x1x32xf32>
    %55 = vector.shape_cast %54 : vector<2x1x32xf32> to vector<2x32xf32>
    %56 = vector.shape_cast %53 : vector<2x32xf32> to vector<2x1x32xf32>
    tpu.vector_store %arg12[%c0_22, %c1_23, %c0_24], %56 {strides = array<i32>} : memref<2x8x32xf32, #tpu.memory_space<vmem>>, vector<2x1x32xf32>,
    %c0_25 = arith.constant 0 : index
    %c2 = arith.constant 2 : index
    %c0_26 = arith.constant 0 : index
    %57 = vector.load %arg11[%c0_25, %c2, %c0_26] : memref<2x8x128xf32, #tpu.memory_space<vmem>>, vector<2x1x128xf32>
    %58 = vector.shape_cast %57 : vector<2x1x128xf32> to vector<2x128xf32>
    %cst_27 = arith.constant dense<0.000000e+00> : vector<2x128xf32>
    %59 = tpu.matmul %53, %9, %cst_27 {dimension_numbers = #tpu.dot_dimension_numbers<[1], [0], [0], [1], [0, 0, 1, 1], [], []>} : vector<2x32xf32>, vector<32x128xf32>, vector<2x128xf32> -> vector<2x128xf32>
    %60 = arith.addf %58, %59 : vector<2x128xf32>
    %61 = arith.negf %60 : vector<2x128xf32>
    %62 = math.exp %61 : vector<2x128xf32>
    %cst_28 = arith.constant 1.000000e+00 : f32
    %63 = vector.broadcast %cst_28 : f32 to vector<2x128xf32>
    %64 = arith.addf %63, %62 : vector<2x128xf32>
    %65 = arith.divf %63, %64 : vector<2x128xf32>
    %66 = math.tanh %60 : vector<2x128xf32>
    %67 = arith.select %5, %66, %65 : vector<2x128xi1>, vector<2x128xf32>
    %68 = vector.extract_strided_slice %67 {offsets = [0, 0], sizes = [2, 32], strides = [1, 1]} : vector<2x128xf32> to vector<2x32xf32>
    %69 = vector.extract_strided_slice %67 {offsets = [0, 32], sizes = [2, 32], strides = [1, 1]} : vector<2x128xf32> to vector<2x32xf32>
    %70 = vector.extract_strided_slice %67 {offsets = [0, 64], sizes = [2, 32], strides = [1, 1]} : vector<2x128xf32> to vector<2x32xf32>
    %71 = vector.extract_strided_slice %67 {offsets = [0, 96], sizes = [2, 32], strides = [1, 1]} : vector<2x128xf32> to vector<2x32xf32>
    %72 = arith.mulf %69, %51 : vector<2x32xf32>
    %73 = arith.mulf %68, %70 : vector<2x32xf32>
    %74 = arith.addf %72, %73 : vector<2x32xf32>
    %75 = math.tanh %74 : vector<2x32xf32>
    %76 = arith.mulf %71, %75 : vector<2x32xf32>
    %c0_29 = arith.constant 0 : index
    %c2_30 = arith.constant 2 : index
    %c0_31 = arith.constant 0 : index
    %77 = vector.load %arg12[%c0_29, %c2_30, %c0_31] : memref<2x8x32xf32, #tpu.memory_space<vmem>>, vector<2x1x32xf32>
    %78 = vector.shape_cast %77 : vector<2x1x32xf32> to vector<2x32xf32>
    %79 = vector.shape_cast %76 : vector<2x32xf32> to vector<2x1x32xf32>
    tpu.vector_store %arg12[%c0_29, %c2_30, %c0_31], %79 {strides = array<i32>} : memref<2x8x32xf32, #tpu.memory_space<vmem>>, vector<2x1x32xf32>,
    %c0_32 = arith.constant 0 : index
    %c3 = arith.constant 3 : index
    %c0_33 = arith.constant 0 : index
    %80 = vector.load %arg11[%c0_32, %c3, %c0_33] : memref<2x8x128xf32, #tpu.memory_space<vmem>>, vector<2x1x128xf32>
    %81 = vector.shape_cast %80 : vector<2x1x128xf32> to vector<2x128xf32>
    %cst_34 = arith.constant dense<0.000000e+00> : vector<2x128xf32>
    %82 = tpu.matmul %76, %9, %cst_34 {dimension_numbers = #tpu.dot_dimension_numbers<[1], [0], [0], [1], [0, 0, 1, 1], [], []>} : vector<2x32xf32>, vector<32x128xf32>, vector<2x128xf32> -> vector<2x128xf32>
    %83 = arith.addf %81, %82 : vector<2x128xf32>
    %84 = arith.negf %83 : vector<2x128xf32>
    %85 = math.exp %84 : vector<2x128xf32>
    %cst_35 = arith.constant 1.000000e+00 : f32
    %86 = vector.broadcast %cst_35 : f32 to vector<2x128xf32>
    %87 = arith.addf %86, %85 : vector<2x128xf32>
    %88 = arith.divf %86, %87 : vector<2x128xf32>
    %89 = math.tanh %83 : vector<2x128xf32>
    %90 = arith.select %5, %89, %88 : vector<2x128xi1>, vector<2x128xf32>
    %91 = vector.extract_strided_slice %90 {offsets = [0, 0], sizes = [2, 32], strides = [1, 1]} : vector<2x128xf32> to vector<2x32xf32>
    %92 = vector.extract_strided_slice %90 {offsets = [0, 32], sizes = [2, 32], strides = [1, 1]} : vector<2x128xf32> to vector<2x32xf32>
    %93 = vector.extract_strided_slice %90 {offsets = [0, 64], sizes = [2, 32], strides = [1, 1]} : vector<2x128xf32> to vector<2x32xf32>
    %94 = vector.extract_strided_slice %90 {offsets = [0, 96], sizes = [2, 32], strides = [1, 1]} : vector<2x128xf32> to vector<2x32xf32>
    %95 = arith.mulf %92, %74 : vector<2x32xf32>
    %96 = arith.mulf %91, %93 : vector<2x32xf32>
    %97 = arith.addf %95, %96 : vector<2x32xf32>
    %98 = math.tanh %97 : vector<2x32xf32>
    %99 = arith.mulf %94, %98 : vector<2x32xf32>
    %c0_36 = arith.constant 0 : index
    %c3_37 = arith.constant 3 : index
    %c0_38 = arith.constant 0 : index
    %100 = vector.load %arg12[%c0_36, %c3_37, %c0_38] : memref<2x8x32xf32, #tpu.memory_space<vmem>>, vector<2x1x32xf32>
    %101 = vector.shape_cast %100 : vector<2x1x32xf32> to vector<2x32xf32>
    %102 = vector.shape_cast %99 : vector<2x32xf32> to vector<2x1x32xf32>
    tpu.vector_store %arg12[%c0_36, %c3_37, %c0_38], %102 {strides = array<i32>} : memref<2x8x32xf32, #tpu.memory_space<vmem>>, vector<2x1x32xf32>,
    %c0_39 = arith.constant 0 : index
    %c4 = arith.constant 4 : index
    %c0_40 = arith.constant 0 : index
    %103 = vector.load %arg11[%c0_39, %c4, %c0_40] : memref<2x8x128xf32, #tpu.memory_space<vmem>>, vector<2x1x128xf32>
    %104 = vector.shape_cast %103 : vector<2x1x128xf32> to vector<2x128xf32>
    %cst_41 = arith.constant dense<0.000000e+00> : vector<2x128xf32>
    %105 = tpu.matmul %99, %9, %cst_41 {dimension_numbers = #tpu.dot_dimension_numbers<[1], [0], [0], [1], [0, 0, 1, 1], [], []>} : vector<2x32xf32>, vector<32x128xf32>, vector<2x128xf32> -> vector<2x128xf32>
    %106 = arith.addf %104, %105 : vector<2x128xf32>
    %107 = arith.negf %106 : vector<2x128xf32>
    %108 = math.exp %107 : vector<2x128xf32>
    %cst_42 = arith.constant 1.000000e+00 : f32
    %109 = vector.broadcast %cst_42 : f32 to vector<2x128xf32>
    %110 = arith.addf %109, %108 : vector<2x128xf32>
    %111 = arith.divf %109, %110 : vector<2x128xf32>
    %112 = math.tanh %106 : vector<2x128xf32>
    %113 = arith.select %5, %112, %111 : vector<2x128xi1>, vector<2x128xf32>
    %114 = vector.extract_strided_slice %113 {offsets = [0, 0], sizes = [2, 32], strides = [1, 1]} : vector<2x128xf32> to vector<2x32xf32>
    %115 = vector.extract_strided_slice %113 {offsets = [0, 32], sizes = [2, 32], strides = [1, 1]} : vector<2x128xf32> to vector<2x32xf32>
    %116 = vector.extract_strided_slice %113 {offsets = [0, 64], sizes = [2, 32], strides = [1, 1]} : vector<2x128xf32> to vector<2x32xf32>
    %117 = vector.extract_strided_slice %113 {offsets = [0, 96], sizes = [2, 32], strides = [1, 1]} : vector<2x128xf32> to vector<2x32xf32>
    %118 = arith.mulf %115, %97 : vector<2x32xf32>
    %119 = arith.mulf %114, %116 : vector<2x32xf32>
    %120 = arith.addf %118, %119 : vector<2x32xf32>
    %121 = math.tanh %120 : vector<2x32xf32>
    %122 = arith.mulf %117, %121 : vector<2x32xf32>
    %c0_43 = arith.constant 0 : index
    %c4_44 = arith.constant 4 : index
    %c0_45 = arith.constant 0 : index
    %123 = vector.load %arg12[%c0_43, %c4_44, %c0_45] : memref<2x8x32xf32, #tpu.memory_space<vmem>>, vector<2x1x32xf32>
    %124 = vector.shape_cast %123 : vector<2x1x32xf32> to vector<2x32xf32>
    %125 = vector.shape_cast %122 : vector<2x32xf32> to vector<2x1x32xf32>
    tpu.vector_store %arg12[%c0_43, %c4_44, %c0_45], %125 {strides = array<i32>} : memref<2x8x32xf32, #tpu.memory_space<vmem>>, vector<2x1x32xf32>,
    %c0_46 = arith.constant 0 : index
    %c5 = arith.constant 5 : index
    %c0_47 = arith.constant 0 : index
    %126 = vector.load %arg11[%c0_46, %c5, %c0_47] : memref<2x8x128xf32, #tpu.memory_space<vmem>>, vector<2x1x128xf32>
    %127 = vector.shape_cast %126 : vector<2x1x128xf32> to vector<2x128xf32>
    %cst_48 = arith.constant dense<0.000000e+00> : vector<2x128xf32>
    %128 = tpu.matmul %122, %9, %cst_48 {dimension_numbers = #tpu.dot_dimension_numbers<[1], [0], [0], [1], [0, 0, 1, 1], [], []>} : vector<2x32xf32>, vector<32x128xf32>, vector<2x128xf32> -> vector<2x128xf32>
    %129 = arith.addf %127, %128 : vector<2x128xf32>
    %130 = arith.negf %129 : vector<2x128xf32>
    %131 = math.exp %130 : vector<2x128xf32>
    %cst_49 = arith.constant 1.000000e+00 : f32
    %132 = vector.broadcast %cst_49 : f32 to vector<2x128xf32>
    %133 = arith.addf %132, %131 : vector<2x128xf32>
    %134 = arith.divf %132, %133 : vector<2x128xf32>
    %135 = math.tanh %129 : vector<2x128xf32>
    %136 = arith.select %5, %135, %134 : vector<2x128xi1>, vector<2x128xf32>
    %137 = vector.extract_strided_slice %136 {offsets = [0, 0], sizes = [2, 32], strides = [1, 1]} : vector<2x128xf32> to vector<2x32xf32>
    %138 = vector.extract_strided_slice %136 {offsets = [0, 32], sizes = [2, 32], strides = [1, 1]} : vector<2x128xf32> to vector<2x32xf32>
    %139 = vector.extract_strided_slice %136 {offsets = [0, 64], sizes = [2, 32], strides = [1, 1]} : vector<2x128xf32> to vector<2x32xf32>
    %140 = vector.extract_strided_slice %136 {offsets = [0, 96], sizes = [2, 32], strides = [1, 1]} : vector<2x128xf32> to vector<2x32xf32>
    %141 = arith.mulf %138, %120 : vector<2x32xf32>
    %142 = arith.mulf %137, %139 : vector<2x32xf32>
    %143 = arith.addf %141, %142 : vector<2x32xf32>
    %144 = math.tanh %143 : vector<2x32xf32>
    %145 = arith.mulf %140, %144 : vector<2x32xf32>
    %c0_50 = arith.constant 0 : index
    %c5_51 = arith.constant 5 : index
    %c0_52 = arith.constant 0 : index
    %146 = vector.load %arg12[%c0_50, %c5_51, %c0_52] : memref<2x8x32xf32, #tpu.memory_space<vmem>>, vector<2x1x32xf32>
    %147 = vector.shape_cast %146 : vector<2x1x32xf32> to vector<2x32xf32>
    %148 = vector.shape_cast %145 : vector<2x32xf32> to vector<2x1x32xf32>
    tpu.vector_store %arg12[%c0_50, %c5_51, %c0_52], %148 {strides = array<i32>} : memref<2x8x32xf32, #tpu.memory_space<vmem>>, vector<2x1x32xf32>,
    %c0_53 = arith.constant 0 : index
    %c6 = arith.constant 6 : index
    %c0_54 = arith.constant 0 : index
    %149 = vector.load %arg11[%c0_53, %c6, %c0_54] : memref<2x8x128xf32, #tpu.memory_space<vmem>>, vector<2x1x128xf32>
    %150 = vector.shape_cast %149 : vector<2x1x128xf32> to vector<2x128xf32>
    %cst_55 = arith.constant dense<0.000000e+00> : vector<2x128xf32>
    %151 = tpu.matmul %145, %9, %cst_55 {dimension_numbers = #tpu.dot_dimension_numbers<[1], [0], [0], [1], [0, 0, 1, 1], [], []>} : vector<2x32xf32>, vector<32x128xf32>, vector<2x128xf32> -> vector<2x128xf32>
    %152 = arith.addf %150, %151 : vector<2x128xf32>
    %153 = arith.negf %152 : vector<2x128xf32>
    %154 = math.exp %153 : vector<2x128xf32>
    %cst_56 = arith.constant 1.000000e+00 : f32
    %155 = vector.broadcast %cst_56 : f32 to vector<2x128xf32>
    %156 = arith.addf %155, %154 : vector<2x128xf32>
    %157 = arith.divf %155, %156 : vector<2x128xf32>
    %158 = math.tanh %152 : vector<2x128xf32>
    %159 = arith.select %5, %158, %157 : vector<2x128xi1>, vector<2x128xf32>
    %160 = vector.extract_strided_slice %159 {offsets = [0, 0], sizes = [2, 32], strides = [1, 1]} : vector<2x128xf32> to vector<2x32xf32>
    %161 = vector.extract_strided_slice %159 {offsets = [0, 32], sizes = [2, 32], strides = [1, 1]} : vector<2x128xf32> to vector<2x32xf32>
    %162 = vector.extract_strided_slice %159 {offsets = [0, 64], sizes = [2, 32], strides = [1, 1]} : vector<2x128xf32> to vector<2x32xf32>
    %163 = vector.extract_strided_slice %159 {offsets = [0, 96], sizes = [2, 32], strides = [1, 1]} : vector<2x128xf32> to vector<2x32xf32>
    %164 = arith.mulf %161, %143 : vector<2x32xf32>
    %165 = arith.mulf %160, %162 : vector<2x32xf32>
    %166 = arith.addf %164, %165 : vector<2x32xf32>
    %167 = math.tanh %166 : vector<2x32xf32>
    %168 = arith.mulf %163, %167 : vector<2x32xf32>
    %c0_57 = arith.constant 0 : index
    %c6_58 = arith.constant 6 : index
    %c0_59 = arith.constant 0 : index
    %169 = vector.load %arg12[%c0_57, %c6_58, %c0_59] : memref<2x8x32xf32, #tpu.memory_space<vmem>>, vector<2x1x32xf32>
    %170 = vector.shape_cast %169 : vector<2x1x32xf32> to vector<2x32xf32>
    %171 = vector.shape_cast %168 : vector<2x32xf32> to vector<2x1x32xf32>
    tpu.vector_store %arg12[%c0_57, %c6_58, %c0_59], %171 {strides = array<i32>} : memref<2x8x32xf32, #tpu.memory_space<vmem>>, vector<2x1x32xf32>,
    %c0_60 = arith.constant 0 : index
    %c7 = arith.constant 7 : index
    %c0_61 = arith.constant 0 : index
    %172 = vector.load %arg11[%c0_60, %c7, %c0_61] : memref<2x8x128xf32, #tpu.memory_space<vmem>>, vector<2x1x128xf32>
    %173 = vector.shape_cast %172 : vector<2x1x128xf32> to vector<2x128xf32>
    %cst_62 = arith.constant dense<0.000000e+00> : vector<2x128xf32>
    %174 = tpu.matmul %168, %9, %cst_62 {dimension_numbers = #tpu.dot_dimension_numbers<[1], [0], [0], [1], [0, 0, 1, 1], [], []>} : vector<2x32xf32>, vector<32x128xf32>, vector<2x128xf32> -> vector<2x128xf32>
    %175 = arith.addf %173, %174 : vector<2x128xf32>
    %176 = arith.negf %175 : vector<2x128xf32>
    %177 = math.exp %176 : vector<2x128xf32>
    %cst_63 = arith.constant 1.000000e+00 : f32
    %178 = vector.broadcast %cst_63 : f32 to vector<2x128xf32>
    %179 = arith.addf %178, %177 : vector<2x128xf32>
    %180 = arith.divf %178, %179 : vector<2x128xf32>
    %181 = math.tanh %175 : vector<2x128xf32>
    %182 = arith.select %5, %181, %180 : vector<2x128xi1>, vector<2x128xf32>
    %183 = vector.extract_strided_slice %182 {offsets = [0, 0], sizes = [2, 32], strides = [1, 1]} : vector<2x128xf32> to vector<2x32xf32>
    %184 = vector.extract_strided_slice %182 {offsets = [0, 32], sizes = [2, 32], strides = [1, 1]} : vector<2x128xf32> to vector<2x32xf32>
    %185 = vector.extract_strided_slice %182 {offsets = [0, 64], sizes = [2, 32], strides = [1, 1]} : vector<2x128xf32> to vector<2x32xf32>
    %186 = vector.extract_strided_slice %182 {offsets = [0, 96], sizes = [2, 32], strides = [1, 1]} : vector<2x128xf32> to vector<2x32xf32>
    %187 = arith.mulf %184, %166 : vector<2x32xf32>
    %188 = arith.mulf %183, %185 : vector<2x32xf32>
    %189 = arith.addf %187, %188 : vector<2x32xf32>
    %190 = math.tanh %189 : vector<2x32xf32>
    %191 = arith.mulf %186, %190 : vector<2x32xf32>
    %c0_64 = arith.constant 0 : index
    %c7_65 = arith.constant 7 : index
    %c0_66 = arith.constant 0 : index
    %192 = vector.load %arg12[%c0_64, %c7_65, %c0_66] : memref<2x8x32xf32, #tpu.memory_space<vmem>>, vector<2x1x32xf32>
    %193 = vector.shape_cast %192 : vector<2x1x32xf32> to vector<2x32xf32>
    %194 = vector.shape_cast %191 : vector<2x32xf32> to vector<2x1x32xf32>
    tpu.vector_store %arg12[%c0_64, %c7_65, %c0_66], %194 {strides = array<i32>} : memref<2x8x32xf32, #tpu.memory_space<vmem>>, vector<2x1x32xf32>,
    %c0_67 = arith.constant 0 : index
    %c0_68 = arith.constant 0 : index
    %195 = vector.load %arg5[%c0_67, %c0_68] : memref<32x128xf32, #tpu.memory_space<vmem>>, vector<32x128xf32>
    %c0_69 = arith.constant 0 : index
    %c0_70 = arith.constant 0 : index
    %196 = vector.load %arg6[%c0_69, %c0_70] : memref<32x128xf32, #tpu.memory_space<vmem>>, vector<32x128xf32>
    %c0_71 = arith.constant 0 : index
    %c0_72 = arith.constant 0 : index
    %197 = vector.load %arg7[%c0_71, %c0_72] : memref<1x128xf32, #tpu.memory_space<vmem>>, vector<1x128xf32>
    %c0_73 = arith.constant 0 : index
    %c0_74 = arith.constant 0 : index
    %c0_75 = arith.constant 0 : index
    %198 = vector.load %arg12[%c0_73, %c0_74, %c0_75] : memref<2x8x32xf32, #tpu.memory_space<vmem>>, vector<2x8x32xf32>
    %199 = vector.shape_cast %198 : vector<2x8x32xf32> to vector<16x32xf32>
    %cst_76 = arith.constant dense<0.000000e+00> : vector<16x128xf32>
    %200 = tpu.matmul %199, %195, %cst_76 {dimension_numbers = #tpu.dot_dimension_numbers<[1], [0], [0], [1], [0, 0, 1, 1], [], []>} : vector<16x32xf32>, vector<32x128xf32>, vector<16x128xf32> -> vector<16x128xf32>
    %201 = vector.broadcast %197 : vector<1x128xf32> to vector<16x128xf32>
    %202 = arith.addf %200, %201 : vector<16x128xf32>
    %203 = vector.shape_cast %202 : vector<16x128xf32> to vector<2x8x128xf32>
    %c0_77 = arith.constant 0 : index
    %c0_78 = arith.constant 0 : index
    %c0_79 = arith.constant 0 : index
    %204 = vector.load %arg11[%c0_77, %c0_78, %c0_79] : memref<2x8x128xf32, #tpu.memory_space<vmem>>, vector<2x8x128xf32>
    tpu.vector_store %arg11[%c0_77, %c0_78, %c0_79], %203 {strides = array<i32>} : memref<2x8x128xf32, #tpu.memory_space<vmem>>, vector<2x8x128xf32>,
    %c0_80 = arith.constant 0 : index
    %c0_81 = arith.constant 0 : index
    %c0_82 = arith.constant 0 : index
    %205 = vector.load %arg11[%c0_80, %c0_81, %c0_82] : memref<2x8x128xf32, #tpu.memory_space<vmem>>, vector<2x1x128xf32>
    %206 = vector.shape_cast %205 : vector<2x1x128xf32> to vector<2x128xf32>
    %207 = arith.negf %206 : vector<2x128xf32>
    %208 = math.exp %207 : vector<2x128xf32>
    %cst_83 = arith.constant 1.000000e+00 : f32
    %209 = vector.broadcast %cst_83 : f32 to vector<2x128xf32>
    %210 = arith.addf %209, %208 : vector<2x128xf32>
    %211 = arith.divf %209, %210 : vector<2x128xf32>
    %212 = math.tanh %206 : vector<2x128xf32>
    %213 = arith.select %5, %212, %211 : vector<2x128xi1>, vector<2x128xf32>
    %214 = vector.extract_strided_slice %213 {offsets = [0, 0], sizes = [2, 32], strides = [1, 1]} : vector<2x128xf32> to vector<2x32xf32>
    %215 = vector.extract_strided_slice %213 {offsets = [0, 64], sizes = [2, 32], strides = [1, 1]} : vector<2x128xf32> to vector<2x32xf32>
    %216 = vector.extract_strided_slice %213 {offsets = [0, 96], sizes = [2, 32], strides = [1, 1]} : vector<2x128xf32> to vector<2x32xf32>
    %217 = arith.mulf %214, %215 : vector<2x32xf32>
    %218 = math.tanh %217 : vector<2x32xf32>
    %219 = arith.mulf %216, %218 : vector<2x32xf32>
    %c0_84 = arith.constant 0 : index
    %c0_85 = arith.constant 0 : index
    %c0_86 = arith.constant 0 : index
    %220 = vector.load %arg12[%c0_84, %c0_85, %c0_86] : memref<2x8x32xf32, #tpu.memory_space<vmem>>, vector<2x1x32xf32>
    %221 = vector.shape_cast %220 : vector<2x1x32xf32> to vector<2x32xf32>
    %222 = vector.shape_cast %219 : vector<2x32xf32> to vector<2x1x32xf32>
    tpu.vector_store %arg12[%c0_84, %c0_85, %c0_86], %222 {strides = array<i32>} : memref<2x8x32xf32, #tpu.memory_space<vmem>>, vector<2x1x32xf32>,
    %c0_87 = arith.constant 0 : index
    %c1_88 = arith.constant 1 : index
    %c0_89 = arith.constant 0 : index
    %223 = vector.load %arg11[%c0_87, %c1_88, %c0_89] : memref<2x8x128xf32, #tpu.memory_space<vmem>>, vector<2x1x128xf32>
    %224 = vector.shape_cast %223 : vector<2x1x128xf32> to vector<2x128xf32>
    %cst_90 = arith.constant dense<0.000000e+00> : vector<2x128xf32>
    %225 = tpu.matmul %219, %196, %cst_90 {dimension_numbers = #tpu.dot_dimension_numbers<[1], [0], [0], [1], [0, 0, 1, 1], [], []>} : vector<2x32xf32>, vector<32x128xf32>, vector<2x128xf32> -> vector<2x128xf32>
    %226 = arith.addf %224, %225 : vector<2x128xf32>
    %227 = arith.negf %226 : vector<2x128xf32>
    %228 = math.exp %227 : vector<2x128xf32>
    %cst_91 = arith.constant 1.000000e+00 : f32
    %229 = vector.broadcast %cst_91 : f32 to vector<2x128xf32>
    %230 = arith.addf %229, %228 : vector<2x128xf32>
    %231 = arith.divf %229, %230 : vector<2x128xf32>
    %232 = math.tanh %226 : vector<2x128xf32>
    %233 = arith.select %5, %232, %231 : vector<2x128xi1>, vector<2x128xf32>
    %234 = vector.extract_strided_slice %233 {offsets = [0, 0], sizes = [2, 32], strides = [1, 1]} : vector<2x128xf32> to vector<2x32xf32>
    %235 = vector.extract_strided_slice %233 {offsets = [0, 32], sizes = [2, 32], strides = [1, 1]} : vector<2x128xf32> to vector<2x32xf32>
    %236 = vector.extract_strided_slice %233 {offsets = [0, 64], sizes = [2, 32], strides = [1, 1]} : vector<2x128xf32> to vector<2x32xf32>
    %237 = vector.extract_strided_slice %233 {offsets = [0, 96], sizes = [2, 32], strides = [1, 1]} : vector<2x128xf32> to vector<2x32xf32>
    %238 = arith.mulf %235, %217 : vector<2x32xf32>
    %239 = arith.mulf %234, %236 : vector<2x32xf32>
    %240 = arith.addf %238, %239 : vector<2x32xf32>
    %241 = math.tanh %240 : vector<2x32xf32>
    %242 = arith.mulf %237, %241 : vector<2x32xf32>
    %c0_92 = arith.constant 0 : index
    %c1_93 = arith.constant 1 : index
    %c0_94 = arith.constant 0 : index
    %243 = vector.load %arg12[%c0_92, %c1_93, %c0_94] : memref<2x8x32xf32, #tpu.memory_space<vmem>>, vector<2x1x32xf32>
    %244 = vector.shape_cast %243 : vector<2x1x32xf32> to vector<2x32xf32>
    %245 = vector.shape_cast %242 : vector<2x32xf32> to vector<2x1x32xf32>
    tpu.vector_store %arg12[%c0_92, %c1_93, %c0_94], %245 {strides = array<i32>} : memref<2x8x32xf32, #tpu.memory_space<vmem>>, vector<2x1x32xf32>,
    %c0_95 = arith.constant 0 : index
    %c2_96 = arith.constant 2 : index
    %c0_97 = arith.constant 0 : index
    %246 = vector.load %arg11[%c0_95, %c2_96, %c0_97] : memref<2x8x128xf32, #tpu.memory_space<vmem>>, vector<2x1x128xf32>
    %247 = vector.shape_cast %246 : vector<2x1x128xf32> to vector<2x128xf32>
    %cst_98 = arith.constant dense<0.000000e+00> : vector<2x128xf32>
    %248 = tpu.matmul %242, %196, %cst_98 {dimension_numbers = #tpu.dot_dimension_numbers<[1], [0], [0], [1], [0, 0, 1, 1], [], []>} : vector<2x32xf32>, vector<32x128xf32>, vector<2x128xf32> -> vector<2x128xf32>
    %249 = arith.addf %247, %248 : vector<2x128xf32>
    %250 = arith.negf %249 : vector<2x128xf32>
    %251 = math.exp %250 : vector<2x128xf32>
    %cst_99 = arith.constant 1.000000e+00 : f32
    %252 = vector.broadcast %cst_99 : f32 to vector<2x128xf32>
    %253 = arith.addf %252, %251 : vector<2x128xf32>
    %254 = arith.divf %252, %253 : vector<2x128xf32>
    %255 = math.tanh %249 : vector<2x128xf32>
    %256 = arith.select %5, %255, %254 : vector<2x128xi1>, vector<2x128xf32>
    %257 = vector.extract_strided_slice %256 {offsets = [0, 0], sizes = [2, 32], strides = [1, 1]} : vector<2x128xf32> to vector<2x32xf32>
    %258 = vector.extract_strided_slice %256 {offsets = [0, 32], sizes = [2, 32], strides = [1, 1]} : vector<2x128xf32> to vector<2x32xf32>
    %259 = vector.extract_strided_slice %256 {offsets = [0, 64], sizes = [2, 32], strides = [1, 1]} : vector<2x128xf32> to vector<2x32xf32>
    %260 = vector.extract_strided_slice %256 {offsets = [0, 96], sizes = [2, 32], strides = [1, 1]} : vector<2x128xf32> to vector<2x32xf32>
    %261 = arith.mulf %258, %240 : vector<2x32xf32>
    %262 = arith.mulf %257, %259 : vector<2x32xf32>
    %263 = arith.addf %261, %262 : vector<2x32xf32>
    %264 = math.tanh %263 : vector<2x32xf32>
    %265 = arith.mulf %260, %264 : vector<2x32xf32>
    %c0_100 = arith.constant 0 : index
    %c2_101 = arith.constant 2 : index
    %c0_102 = arith.constant 0 : index
    %266 = vector.load %arg12[%c0_100, %c2_101, %c0_102] : memref<2x8x32xf32, #tpu.memory_space<vmem>>, vector<2x1x32xf32>
    %267 = vector.shape_cast %266 : vector<2x1x32xf32> to vector<2x32xf32>
    %268 = vector.shape_cast %265 : vector<2x32xf32> to vector<2x1x32xf32>
    tpu.vector_store %arg12[%c0_100, %c2_101, %c0_102], %268 {strides = array<i32>} : memref<2x8x32xf32, #tpu.memory_space<vmem>>, vector<2x1x32xf32>,
    %c0_103 = arith.constant 0 : index
    %c3_104 = arith.constant 3 : index
    %c0_105 = arith.constant 0 : index
    %269 = vector.load %arg11[%c0_103, %c3_104, %c0_105] : memref<2x8x128xf32, #tpu.memory_space<vmem>>, vector<2x1x128xf32>
    %270 = vector.shape_cast %269 : vector<2x1x128xf32> to vector<2x128xf32>
    %cst_106 = arith.constant dense<0.000000e+00> : vector<2x128xf32>
    %271 = tpu.matmul %265, %196, %cst_106 {dimension_numbers = #tpu.dot_dimension_numbers<[1], [0], [0], [1], [0, 0, 1, 1], [], []>} : vector<2x32xf32>, vector<32x128xf32>, vector<2x128xf32> -> vector<2x128xf32>
    %272 = arith.addf %270, %271 : vector<2x128xf32>
    %273 = arith.negf %272 : vector<2x128xf32>
    %274 = math.exp %273 : vector<2x128xf32>
    %cst_107 = arith.constant 1.000000e+00 : f32
    %275 = vector.broadcast %cst_107 : f32 to vector<2x128xf32>
    %276 = arith.addf %275, %274 : vector<2x128xf32>
    %277 = arith.divf %275, %276 : vector<2x128xf32>
    %278 = math.tanh %272 : vector<2x128xf32>
    %279 = arith.select %5, %278, %277 : vector<2x128xi1>, vector<2x128xf32>
    %280 = vector.extract_strided_slice %279 {offsets = [0, 0], sizes = [2, 32], strides = [1, 1]} : vector<2x128xf32> to vector<2x32xf32>
    %281 = vector.extract_strided_slice %279 {offsets = [0, 32], sizes = [2, 32], strides = [1, 1]} : vector<2x128xf32> to vector<2x32xf32>
    %282 = vector.extract_strided_slice %279 {offsets = [0, 64], sizes = [2, 32], strides = [1, 1]} : vector<2x128xf32> to vector<2x32xf32>
    %283 = vector.extract_strided_slice %279 {offsets = [0, 96], sizes = [2, 32], strides = [1, 1]} : vector<2x128xf32> to vector<2x32xf32>
    %284 = arith.mulf %281, %263 : vector<2x32xf32>
    %285 = arith.mulf %280, %282 : vector<2x32xf32>
    %286 = arith.addf %284, %285 : vector<2x32xf32>
    %287 = math.tanh %286 : vector<2x32xf32>
    %288 = arith.mulf %283, %287 : vector<2x32xf32>
    %c0_108 = arith.constant 0 : index
    %c3_109 = arith.constant 3 : index
    %c0_110 = arith.constant 0 : index
    %289 = vector.load %arg12[%c0_108, %c3_109, %c0_110] : memref<2x8x32xf32, #tpu.memory_space<vmem>>, vector<2x1x32xf32>
    %290 = vector.shape_cast %289 : vector<2x1x32xf32> to vector<2x32xf32>
    %291 = vector.shape_cast %288 : vector<2x32xf32> to vector<2x1x32xf32>
    tpu.vector_store %arg12[%c0_108, %c3_109, %c0_110], %291 {strides = array<i32>} : memref<2x8x32xf32, #tpu.memory_space<vmem>>, vector<2x1x32xf32>,
    %c0_111 = arith.constant 0 : index
    %c4_112 = arith.constant 4 : index
    %c0_113 = arith.constant 0 : index
    %292 = vector.load %arg11[%c0_111, %c4_112, %c0_113] : memref<2x8x128xf32, #tpu.memory_space<vmem>>, vector<2x1x128xf32>
    %293 = vector.shape_cast %292 : vector<2x1x128xf32> to vector<2x128xf32>
    %cst_114 = arith.constant dense<0.000000e+00> : vector<2x128xf32>
    %294 = tpu.matmul %288, %196, %cst_114 {dimension_numbers = #tpu.dot_dimension_numbers<[1], [0], [0], [1], [0, 0, 1, 1], [], []>} : vector<2x32xf32>, vector<32x128xf32>, vector<2x128xf32> -> vector<2x128xf32>
    %295 = arith.addf %293, %294 : vector<2x128xf32>
    %296 = arith.negf %295 : vector<2x128xf32>
    %297 = math.exp %296 : vector<2x128xf32>
    %cst_115 = arith.constant 1.000000e+00 : f32
    %298 = vector.broadcast %cst_115 : f32 to vector<2x128xf32>
    %299 = arith.addf %298, %297 : vector<2x128xf32>
    %300 = arith.divf %298, %299 : vector<2x128xf32>
    %301 = math.tanh %295 : vector<2x128xf32>
    %302 = arith.select %5, %301, %300 : vector<2x128xi1>, vector<2x128xf32>
    %303 = vector.extract_strided_slice %302 {offsets = [0, 0], sizes = [2, 32], strides = [1, 1]} : vector<2x128xf32> to vector<2x32xf32>
    %304 = vector.extract_strided_slice %302 {offsets = [0, 32], sizes = [2, 32], strides = [1, 1]} : vector<2x128xf32> to vector<2x32xf32>
    %305 = vector.extract_strided_slice %302 {offsets = [0, 64], sizes = [2, 32], strides = [1, 1]} : vector<2x128xf32> to vector<2x32xf32>
    %306 = vector.extract_strided_slice %302 {offsets = [0, 96], sizes = [2, 32], strides = [1, 1]} : vector<2x128xf32> to vector<2x32xf32>
    %307 = arith.mulf %304, %286 : vector<2x32xf32>
    %308 = arith.mulf %303, %305 : vector<2x32xf32>
    %309 = arith.addf %307, %308 : vector<2x32xf32>
    %310 = math.tanh %309 : vector<2x32xf32>
    %311 = arith.mulf %306, %310 : vector<2x32xf32>
    %c0_116 = arith.constant 0 : index
    %c4_117 = arith.constant 4 : index
    %c0_118 = arith.constant 0 : index
    %312 = vector.load %arg12[%c0_116, %c4_117, %c0_118] : memref<2x8x32xf32, #tpu.memory_space<vmem>>, vector<2x1x32xf32>
    %313 = vector.shape_cast %312 : vector<2x1x32xf32> to vector<2x32xf32>
    %314 = vector.shape_cast %311 : vector<2x32xf32> to vector<2x1x32xf32>
    tpu.vector_store %arg12[%c0_116, %c4_117, %c0_118], %314 {strides = array<i32>} : memref<2x8x32xf32, #tpu.memory_space<vmem>>, vector<2x1x32xf32>,
    %c0_119 = arith.constant 0 : index
    %c5_120 = arith.constant 5 : index
    %c0_121 = arith.constant 0 : index
    %315 = vector.load %arg11[%c0_119, %c5_120, %c0_121] : memref<2x8x128xf32, #tpu.memory_space<vmem>>, vector<2x1x128xf32>
    %316 = vector.shape_cast %315 : vector<2x1x128xf32> to vector<2x128xf32>
    %cst_122 = arith.constant dense<0.000000e+00> : vector<2x128xf32>
    %317 = tpu.matmul %311, %196, %cst_122 {dimension_numbers = #tpu.dot_dimension_numbers<[1], [0], [0], [1], [0, 0, 1, 1], [], []>} : vector<2x32xf32>, vector<32x128xf32>, vector<2x128xf32> -> vector<2x128xf32>
    %318 = arith.addf %316, %317 : vector<2x128xf32>
    %319 = arith.negf %318 : vector<2x128xf32>
    %320 = math.exp %319 : vector<2x128xf32>
    %cst_123 = arith.constant 1.000000e+00 : f32
    %321 = vector.broadcast %cst_123 : f32 to vector<2x128xf32>
    %322 = arith.addf %321, %320 : vector<2x128xf32>
    %323 = arith.divf %321, %322 : vector<2x128xf32>
    %324 = math.tanh %318 : vector<2x128xf32>
    %325 = arith.select %5, %324, %323 : vector<2x128xi1>, vector<2x128xf32>
    %326 = vector.extract_strided_slice %325 {offsets = [0, 0], sizes = [2, 32], strides = [1, 1]} : vector<2x128xf32> to vector<2x32xf32>
    %327 = vector.extract_strided_slice %325 {offsets = [0, 32], sizes = [2, 32], strides = [1, 1]} : vector<2x128xf32> to vector<2x32xf32>
    %328 = vector.extract_strided_slice %325 {offsets = [0, 64], sizes = [2, 32], strides = [1, 1]} : vector<2x128xf32> to vector<2x32xf32>
    %329 = vector.extract_strided_slice %325 {offsets = [0, 96], sizes = [2, 32], strides = [1, 1]} : vector<2x128xf32> to vector<2x32xf32>
    %330 = arith.mulf %327, %309 : vector<2x32xf32>
    %331 = arith.mulf %326, %328 : vector<2x32xf32>
    %332 = arith.addf %330, %331 : vector<2x32xf32>
    %333 = math.tanh %332 : vector<2x32xf32>
    %334 = arith.mulf %329, %333 : vector<2x32xf32>
    %c0_124 = arith.constant 0 : index
    %c5_125 = arith.constant 5 : index
    %c0_126 = arith.constant 0 : index
    %335 = vector.load %arg12[%c0_124, %c5_125, %c0_126] : memref<2x8x32xf32, #tpu.memory_space<vmem>>, vector<2x1x32xf32>
    %336 = vector.shape_cast %335 : vector<2x1x32xf32> to vector<2x32xf32>
    %337 = vector.shape_cast %334 : vector<2x32xf32> to vector<2x1x32xf32>
    tpu.vector_store %arg12[%c0_124, %c5_125, %c0_126], %337 {strides = array<i32>} : memref<2x8x32xf32, #tpu.memory_space<vmem>>, vector<2x1x32xf32>,
    %c0_127 = arith.constant 0 : index
    %c6_128 = arith.constant 6 : index
    %c0_129 = arith.constant 0 : index
    %338 = vector.load %arg11[%c0_127, %c6_128, %c0_129] : memref<2x8x128xf32, #tpu.memory_space<vmem>>, vector<2x1x128xf32>
    %339 = vector.shape_cast %338 : vector<2x1x128xf32> to vector<2x128xf32>
    %cst_130 = arith.constant dense<0.000000e+00> : vector<2x128xf32>
    %340 = tpu.matmul %334, %196, %cst_130 {dimension_numbers = #tpu.dot_dimension_numbers<[1], [0], [0], [1], [0, 0, 1, 1], [], []>} : vector<2x32xf32>, vector<32x128xf32>, vector<2x128xf32> -> vector<2x128xf32>
    %341 = arith.addf %339, %340 : vector<2x128xf32>
    %342 = arith.negf %341 : vector<2x128xf32>
    %343 = math.exp %342 : vector<2x128xf32>
    %cst_131 = arith.constant 1.000000e+00 : f32
    %344 = vector.broadcast %cst_131 : f32 to vector<2x128xf32>
    %345 = arith.addf %344, %343 : vector<2x128xf32>
    %346 = arith.divf %344, %345 : vector<2x128xf32>
    %347 = math.tanh %341 : vector<2x128xf32>
    %348 = arith.select %5, %347, %346 : vector<2x128xi1>, vector<2x128xf32>
    %349 = vector.extract_strided_slice %348 {offsets = [0, 0], sizes = [2, 32], strides = [1, 1]} : vector<2x128xf32> to vector<2x32xf32>
    %350 = vector.extract_strided_slice %348 {offsets = [0, 32], sizes = [2, 32], strides = [1, 1]} : vector<2x128xf32> to vector<2x32xf32>
    %351 = vector.extract_strided_slice %348 {offsets = [0, 64], sizes = [2, 32], strides = [1, 1]} : vector<2x128xf32> to vector<2x32xf32>
    %352 = vector.extract_strided_slice %348 {offsets = [0, 96], sizes = [2, 32], strides = [1, 1]} : vector<2x128xf32> to vector<2x32xf32>
    %353 = arith.mulf %350, %332 : vector<2x32xf32>
    %354 = arith.mulf %349, %351 : vector<2x32xf32>
    %355 = arith.addf %353, %354 : vector<2x32xf32>
    %356 = math.tanh %355 : vector<2x32xf32>
    %357 = arith.mulf %352, %356 : vector<2x32xf32>
    %c0_132 = arith.constant 0 : index
    %c6_133 = arith.constant 6 : index
    %c0_134 = arith.constant 0 : index
    %358 = vector.load %arg12[%c0_132, %c6_133, %c0_134] : memref<2x8x32xf32, #tpu.memory_space<vmem>>, vector<2x1x32xf32>
    %359 = vector.shape_cast %358 : vector<2x1x32xf32> to vector<2x32xf32>
    %360 = vector.shape_cast %357 : vector<2x32xf32> to vector<2x1x32xf32>
    tpu.vector_store %arg12[%c0_132, %c6_133, %c0_134], %360 {strides = array<i32>} : memref<2x8x32xf32, #tpu.memory_space<vmem>>, vector<2x1x32xf32>,
    %c0_135 = arith.constant 0 : index
    %c7_136 = arith.constant 7 : index
    %c0_137 = arith.constant 0 : index
    %361 = vector.load %arg11[%c0_135, %c7_136, %c0_137] : memref<2x8x128xf32, #tpu.memory_space<vmem>>, vector<2x1x128xf32>
    %362 = vector.shape_cast %361 : vector<2x1x128xf32> to vector<2x128xf32>
    %cst_138 = arith.constant dense<0.000000e+00> : vector<2x128xf32>
    %363 = tpu.matmul %357, %196, %cst_138 {dimension_numbers = #tpu.dot_dimension_numbers<[1], [0], [0], [1], [0, 0, 1, 1], [], []>} : vector<2x32xf32>, vector<32x128xf32>, vector<2x128xf32> -> vector<2x128xf32>
    %364 = arith.addf %362, %363 : vector<2x128xf32>
    %365 = arith.negf %364 : vector<2x128xf32>
    %366 = math.exp %365 : vector<2x128xf32>
    %cst_139 = arith.constant 1.000000e+00 : f32
    %367 = vector.broadcast %cst_139 : f32 to vector<2x128xf32>
    %368 = arith.addf %367, %366 : vector<2x128xf32>
    %369 = arith.divf %367, %368 : vector<2x128xf32>
    %370 = math.tanh %364 : vector<2x128xf32>
    %371 = arith.select %5, %370, %369 : vector<2x128xi1>, vector<2x128xf32>
    %372 = vector.extract_strided_slice %371 {offsets = [0, 0], sizes = [2, 32], strides = [1, 1]} : vector<2x128xf32> to vector<2x32xf32>
    %373 = vector.extract_strided_slice %371 {offsets = [0, 32], sizes = [2, 32], strides = [1, 1]} : vector<2x128xf32> to vector<2x32xf32>
    %374 = vector.extract_strided_slice %371 {offsets = [0, 64], sizes = [2, 32], strides = [1, 1]} : vector<2x128xf32> to vector<2x32xf32>
    %375 = vector.extract_strided_slice %371 {offsets = [0, 96], sizes = [2, 32], strides = [1, 1]} : vector<2x128xf32> to vector<2x32xf32>
    %376 = arith.mulf %373, %355 : vector<2x32xf32>
    %377 = arith.mulf %372, %374 : vector<2x32xf32>
    %378 = arith.addf %376, %377 : vector<2x32xf32>
    %379 = math.tanh %378 : vector<2x32xf32>
    %380 = arith.mulf %375, %379 : vector<2x32xf32>
    %c0_140 = arith.constant 0 : index
    %c7_141 = arith.constant 7 : index
    %c0_142 = arith.constant 0 : index
    %381 = vector.load %arg12[%c0_140, %c7_141, %c0_142] : memref<2x8x32xf32, #tpu.memory_space<vmem>>, vector<2x1x32xf32>
    %382 = vector.shape_cast %381 : vector<2x1x32xf32> to vector<2x32xf32>
    %383 = vector.shape_cast %380 : vector<2x32xf32> to vector<2x1x32xf32>
    tpu.vector_store %arg12[%c0_140, %c7_141, %c0_142], %383 {strides = array<i32>} : memref<2x8x32xf32, #tpu.memory_space<vmem>>, vector<2x1x32xf32>,
    %c0_143 = arith.constant 0 : index
    %c0_144 = arith.constant 0 : index
    %384 = vector.load %arg8[%c0_143, %c0_144] : memref<32x4xf32, #tpu.memory_space<vmem>>, vector<32x4xf32>
    %c0_145 = arith.constant 0 : index
    %c0_146 = arith.constant 0 : index
    %385 = vector.load %arg9[%c0_145, %c0_146] : memref<1x4xf32, #tpu.memory_space<vmem>>, vector<1x4xf32>
    %c0_147 = arith.constant 0 : index
    %c0_148 = arith.constant 0 : index
    %c0_149 = arith.constant 0 : index
    %386 = vector.load %arg12[%c0_147, %c0_148, %c0_149] : memref<2x8x32xf32, #tpu.memory_space<vmem>>, vector<2x8x32xf32>
    %387 = vector.shape_cast %386 : vector<2x8x32xf32> to vector<16x32xf32>
    %cst_150 = arith.constant dense<0.000000e+00> : vector<16x4xf32>
    %388 = tpu.matmul %387, %384, %cst_150 {dimension_numbers = #tpu.dot_dimension_numbers<[1], [0], [0], [1], [0, 0, 1, 1], [], []>} : vector<16x32xf32>, vector<32x4xf32>, vector<16x4xf32> -> vector<16x4xf32>
    %389 = vector.broadcast %385 : vector<1x4xf32> to vector<16x4xf32>
    %390 = arith.addf %388, %389 : vector<16x4xf32>
    %391 = math.tanh %390 : vector<16x4xf32>
    %392 = vector.shape_cast %391 : vector<16x4xf32> to vector<2x8x4xf32>
    %c0_151 = arith.constant 0 : index
    %c0_152 = arith.constant 0 : index
    %c0_153 = arith.constant 0 : index
    %393 = vector.load %arg10[%c0_151, %c0_152, %c0_153] : memref<2x8x4xf32, #tpu.memory_space<vmem>>, vector<2x8x4xf32>
    tpu.vector_store %arg10[%c0_151, %c0_152, %c0_153], %392 {strides = array<i32>} : memref<2x8x4xf32, #tpu.memory_space<vmem>>, vector<2x8x4xf32>,
    return
  }
  func.func @transform_0(%arg0: i32) -> (i32, i32, i32) {
    %c0_i32 = arith.constant 0 : i32
    %c0_i32_0 = arith.constant 0 : i32
    %c0_i32_1 = arith.constant 0 : i32
    %c0_i32_2 = arith.constant 0 : i32
    return %c0_i32, %c0_i32_0, %c0_i32_1 : i32, i32, i32
  }
  func.func @transform_1(%arg0: i32) -> (i32, i32) {
    %c0_i32 = arith.constant 0 : i32
    %c0_i32_0 = arith.constant 0 : i32
    %c0_i32_1 = arith.constant 0 : i32
    return %c0_i32, %c0_i32_0 : i32, i32
  }
  func.func @transform_2(%arg0: i32) -> (i32, i32) {
    %c0_i32 = arith.constant 0 : i32
    %c0_i32_0 = arith.constant 0 : i32
    %c0_i32_1 = arith.constant 0 : i32
    return %c0_i32, %c0_i32_0 : i32, i32
  }
  func.func @transform_3(%arg0: i32) -> (i32, i32) {
    %c0_i32 = arith.constant 0 : i32
    %c0_i32_0 = arith.constant 0 : i32
    %c0_i32_1 = arith.constant 0 : i32
    return %c0_i32, %c0_i32_0 : i32, i32
  }
  func.func @transform_4(%arg0: i32) -> (i32, i32) {
    %c0_i32 = arith.constant 0 : i32
    %c0_i32_0 = arith.constant 0 : i32
    %c0_i32_1 = arith.constant 0 : i32
    return %c0_i32, %c0_i32_0 : i32, i32
  }
  func.func @transform_5(%arg0: i32) -> (i32, i32) {
    %c0_i32 = arith.constant 0 : i32
    %c0_i32_0 = arith.constant 0 : i32
    %c0_i32_1 = arith.constant 0 : i32
    return %c0_i32, %c0_i32_0 : i32, i32
  }
  func.func @transform_6(%arg0: i32) -> (i32, i32) {
    %c0_i32 = arith.constant 0 : i32
    %c0_i32_0 = arith.constant 0 : i32
    %c0_i32_1 = arith.constant 0 : i32
    return %c0_i32, %c0_i32_0 : i32, i32
  }
  func.func @transform_7(%arg0: i32) -> (i32, i32) {
    %c0_i32 = arith.constant 0 : i32
    %c0_i32_0 = arith.constant 0 : i32
    %c0_i32_1 = arith.constant 0 : i32
    return %c0_i32, %c0_i32_0 : i32, i32
  }
  func.func @transform_8(%arg0: i32) -> (i32, i32) {
    %c0_i32 = arith.constant 0 : i32
    %c0_i32_0 = arith.constant 0 : i32
    %c0_i32_1 = arith.constant 0 : i32
    return %c0_i32, %c0_i32_0 : i32, i32
  }
  func.func @transform_9(%arg0: i32) -> (i32, i32, i32) {
    %c0_i32 = arith.constant 0 : i32
    %c0_i32_0 = arith.constant 0 : i32
    %c0_i32_1 = arith.constant 0 : i32
    %c0_i32_2 = arith.constant 0 : i32
    return %c0_i32, %c0_i32_0, %c0_i32_1 : i32, i32, i32
  }
}

</mosaic_0001>

<bundles_post_ra>
// kernel: actor_lstm_forward.1
= control target key start
LH: loop header
LB: loop body
LE: loop exit
PB: predicated region body
PF: predicated region fallthrough
CT: control target
= control target key end

     0   :  { %14 = vsyncpa [#allocation5], 0  ;;  %s4131_s0 = inlined_call_operand.hbm [shape: f32[2,8,16], index: 0, kind: input, shape index: {}]   ;;  %s4132_s1 = inlined_call_operand.vmem [shape: f32[16,128], index: 1, kind: input, shape index: {}]   ;;  %s4133_s2 = inlined_call_operand.vmem [shape: f32[32,128], index: 2, kind: input, shape index: {}]   ;;  %s4134_s3 = inlined_call_operand.vmem [shape: f32[1,128], index: 3, kind: input, shape index: {}]   ;;  %s4135_s4 = inlined_call_operand.vmem [shape: f32[32,128], index: 4, kind: input, shape index: {}]   ;;  %s4136_s5 = inlined_call_operand.hbm [shape: f32[32,128], index: 5, kind: input, shape index: {}]   ;;  %s4137_s6 = inlined_call_operand.vmem [shape: f32[1,128], index: 6, kind: input, shape index: {}]   ;;  %s4138_s7 = inlined_call_operand.vmem [shape: f32[32,4], index: 7, kind: input, shape index: {}]   ;;  %s4139_s8 = inlined_call_operand.vmem [shape: f32[1,4], index: 8, kind: input, shape index: {}]   ;;  %s4140_s9 = inlined_call_operand.vmem [shape: f32[2,8,4], index: 9, kind: output, shape index: {}]  }
   0x1   :  { %15 = vsyncpa [#allocation7], 0  ;;  %s3531_s30 = smov [#allocation4]   ;;  %s3483_s13 = scalar_lea.hbm %s4131_s0, 256 }
   0x2   :  { %s21_s10 = sshll.u32 %s3531_s30, 4  ;;  %p3484_p0 = scmp.ne.s32.totalorder %s4131_s0, %s3483_s13  ;;  %s22_s10 = int_to_ptr.vmem [resolvable:$true] %s21_s10 }
   0x3   :  { %p3487_p1 = scmp.lt.u32.totalorder %s3483_s13, %s4131_s0 }
   0x5   :  { %p3489_p2 = pnand %p3487_p1, %p3484_p0 }
   0x7   :  { %3492 = shalt.err (!%p3489_p2)
}
   0x8   :  { %s3493_s18 = scalar_lea.vmem %s22_s10, 256  ;;  %p3498_p4 = scmp.lt.s32.totalorder %s22_s10, %s22_s10 }
   0x9   :  { %p3494_p3 = scmp.ne.s32.totalorder %s22_s10, %s3493_s18  ;;  %p3499_p5 = scmp.lt.s32.totalorder %s3493_s18, %s3493_s18 }
   0xb   :  { %p3500_p6 = por %p3499_p5, %p3498_p4 }
   0xd   :  { %p3501_p7 = pnand %p3500_p6, %p3494_p3 }
   0xf   :  { %3504 = shalt.err (!%p3501_p7)
}
  0x10   :  { %s3532_s19 = smov 128   ;;  %s3533_s20 = smov 8  }
  0x11   :  { %27 = dma.hbm_to_vmem [thread:$0]  %s4131_s0, 256, %s22_s10, [#allocation5], %s3532_s19, %s3532_s19, %s3533_s20  }
  0x12   :  { %s3534_s23 = smov [#allocation6]   ;;  %s3505_s27 = scalar_lea.hbm %s4136_s5, 512 }
  0x13   :  { %s41_s24 = sshll.u32 %s3534_s23, 4  ;;  %p3506_p8 = scmp.ne.s32.totalorder %s4136_s5, %s3505_s27  ;;  %s42_s24 = int_to_ptr.vmem [resolvable:$true] %s41_s24 }
  0x14   :  { %p3509_p9 = scmp.lt.u32.totalorder %s3505_s27, %s4136_s5 }
  0x16   :  { %p3511_p10 = pnand %p3509_p9, %p3506_p8 }
  0x18   :  { %3514 = shalt.err (!%p3511_p10)
}
  0x19   :  { %s3515_s12 = scalar_lea.vmem %s42_s24, 512  ;;  %p3520_p12 = scmp.lt.s32.totalorder %s42_s24, %s42_s24 }
  0x1a   :  { %p3516_p11 = scmp.ne.s32.totalorder %s42_s24, %s3515_s12  ;;  %p3521_p13 = scmp.lt.s32.totalorder %s3515_s12, %s3515_s12 }
  0x1c   :  { %p3522_p0 = por %p3521_p13, %p3520_p12 }
  0x1e   :  { %p3523_p1 = pnand %p3522_p0, %p3516_p11 }
  0x20   :  { %3526 = shalt.err (!%p3523_p1)
}
  0x21   :  { %47 = dma.hbm_to_vmem [thread:$0]  %s4136_s5, 512, %s42_s24, [#allocation7], %s3532_s19, %s3532_s19, %s3533_s20  }
  0x22   :  { %3527 = dma.done.wait [#allocation5], 256  }
  0x23   :  { %3528 = vsyncadd [#allocation5], 4294967040 }
  0x24   :  { %3529 = dma.done.wait [#allocation7], 512  }
  0x25   :  { %3530 = vsyncadd [#allocation7], 4294966784  ;;  %vm80_vm0 = vcmask 130048   ;;  %v67_v0 = vld [vmem:[%s4132_s1] sm:$0xff]  ;;  %v68_v1 = vld [vmem:[%s4132_s1 + $0x8] sm:$0xff]  ;;  %v60_v18 = vlaneseq  ;;  %vm183_vm3 = vcmask 1041409  }
  0x26   :  { %v65_v2 = vld [vmem:[#allocation4] sm:$0xff]  ;;  %v3140_v3 = vpack.c.bf16 %v68_v1, %v67_v0  ;;  %v66_v4 = vld [vmem:[#allocation4 + $0x8] sm:$0xff]  ;;  %s3535_s1 = smov 64   ;;  %v71_v34 = vld [vmem:[%s4133_s2 + $0x10] sm:$0xff]  ;;  %v3536_v35 = vmov 0.0|0.0   ;;  %vm3537_vm5 = vmmov 0  }
  0x27   :  { %2961 = vmatprep.mubr.msk.f32.mxu0 %vm80_vm0, %v65_v2  ;;  %v2816_v5 = vld [vmem:[%s4134_s3] ss:$0 sm:$0xff]  ;;  %v61_v19 = vand.u32 127, %v60_v18  ;;  %v70_v33 = vld [vmem:[%s4133_s2 + $0x8] sm:$0xff]  ;;  %3144 = vmatprep.subr.bf16.mxu1 %v3536_v35  ;;  %v72_v37 = vld [vmem:[%s4133_s2 + $0x18] sm:$0xff]  ;;  %v3538_v38 = vmov 0.0  }
  0x28   :  { %3141 = vmatprep.subr.bf16.mxu0 %v3140_v3  ;;  %v69_v32 = vld [vmem:[%s4133_s2] sm:$0xff]  ;;  %2972 = vmatprep.mubr.msk.f32.mxu1 %vm3537_vm5, %v3538_v38  ;;  %v3656_v39 = vpack.c.bf16 %v72_v37, %v71_v34  ;;  %s3539_s2 = smov 96   ;;  %s3540_s25 = smov 32   ;;  %vm247_vm6 = vcmask 261120   ;;  %vm240_vm7 = vcmask 253952   ;;  %vm2807_vm8 = vcmask 31744  }
  0x29   :  { %3143 = vmatpush3.bf16.msra.mxu0 %v3140_v3  ;;  %vm62_vm1 = vcmp.ge.s32.totalorder %v61_v19, 64  ;;  %vm63_vm2 = vcmp.lt.s32.totalorder %v61_v19, 96  ;;  %v3645_v36 = vpack.c.bf16 %v70_v33, %v69_v32 }
  0x2a   :  { %vm3626_vm4 = vmand %vm62_vm1, %vm63_vm2  ;;  %3150 = vmatprep.subr.bf16.mxu0 %v3536_v35 }
  0x2b   :  { %3146 = vmatpush3.bf16.msra.mxu1 %v3645_v36 }
  0x2c   :  { %2962 = vmatmul.mubr.msk.f32.vlgmr.msra.gmra.mrb[0].mxu0 %vm80_vm0, %v66_v4  ;;  %3147 = vmatprep.subr.bf16.mxu1 %v3536_v35 }
  0x2d   :  { %2983 = vmatprep.mubr.msk.f32.mxu0 %vm3537_vm5, %v3538_v38  ;;  %3152 = vmatpush3.bf16.msra.mxu0 %v3645_v36 }
  0x2e   :  { %3153 = vmatprep.subr.bf16.mxu0 %v3536_v35 }
  0x2f   :  { %3149 = vmatpush3.bf16.msra.mxu1 %v3656_v39 }
  0x30   :  { %3156 = vmatprep.subr.bf16.mxu1 %v3536_v35 }
  0x31   :  { %3155 = vmatpush3.bf16.msra.mxu0 %v3656_v39 }
  0x32   :  { %3162 = vmatprep.subr.bf16.mxu0 %v3536_v35 }
  0xff   :  { %v2963_v6 = vpop.f32.mrb[0].mxu0 }
 0x100   :  { %v159_v7 = vadd.f32 %v2963_v6, %v2816_v5  ;;  %v153_v8 = vpop.f32.mrb[1].mxu0 }
 0x101   :  { %v154_v9 = vadd.f32 %v2816_v5, %v153_v8 }
 0x102   :  { %163 = vst [vmem:[#allocation2 + $0x8] sm:$0xff] %v159_v7 }
 0x103   :  { %162 = vst [vmem:[#allocation2] sm:$0xff] %v154_v9 }
 0x109   :  { %v165_v10 = vld [vmem:[#allocation2 + $0x8] sm:$0x1]  ;;  %v244_v49 = vld [vmem:[#allocation2 + $0x9] sm:$0x1] }
 0x10a   :  { %v164_v11 = vld [vmem:[#allocation2] sm:$0x1]  ;;  %v2820_v12 = vmul.f32 -1.442695, %v165_v10  ;;  %v243_v44 = vld [vmem:[#allocation2 + $0x1] sm:$0x1] }
 0x10b   :  { %v2819_v13 = vmul.f32 -1.442695, %v164_v11 }
 0x10c   :  { %3255 = vpow2.f32 %v2820_v12  ;;  %v411_v12 = vld [vmem:[#allocation2 + $0x2] sm:$0x1] }
 0x10d   :  { %3257 = vpow2.f32 %v2819_v13 }
 0x10e   :  { %3259 = vtanh.f32 %v165_v10 }
 0x10f   :  { %3261 = vtanh.f32 %v164_v11 }
 0x116   :  { %v3256_v14 = vpop.eup %3255 }
 0x117   :  { %v3258_v15 = vpop.eup %3257  ;;  %v173_v16 = vadd.f32 1.0, %v3256_v14 }
 0x118   :  { %v172_v17 = vadd.f32 1.0, %v3258_v15  ;;  %v3260_v20 = vpop.eup %3259 }
 0x119   :  { %3263 = vrcp.f32 %v173_v16  ;;  %v3262_v21 = vpop.eup %3261  ;;  %v182_v22 = vrot.slane %v3260_v20, 7 }
 0x11a   :  { %3265 = vrcp.f32 %v172_v17  ;;  %v412_v17 = vld [vmem:[#allocation2 + $0xa] sm:$0x1] }
 0x11b   :  { %v184_v27 = vsel %vm183_vm3, %v182_v22, %v3262_v21 }
 0x123   :  { %v3264_v23 = vpop.eup %3263 }
 0x124   :  { %v3266_v24 = vpop.eup %3265  ;;  %v188_v26 = vrot.slane %v3264_v23, 7 }
 0x126   :  { %v189_v28 = vsel %vm183_vm3, %v188_v26, %v3266_v24 }
 0x127   :  { %v191_v29 = vsel %vm3626_vm4, %v184_v27, %v189_v28 }
 0x128   :  { %193 = vrot.lane.b32.xlu0 %v191_v29, %s3535_s1 }
 0x19a   :  { %v194_v30 = vpop.permute.xlu0 %193 }
 0x19b   :  { %v196_v31 = vmul.f32 %v194_v30, %v191_v29 }
 0x19d   :  { %3267 = vtanh.f32 %v196_v31 }
 0x1a7   :  { %v3268_v40 = vpop.eup %3267 }
 0x1a8   :  { %199 = vrot.lane.b32.xlu0 %v3268_v40, %s3539_s2 }
 0x1ac   :  { %352 = vrot.lane.b32.xlu0 %v196_v31, %s3540_s25 }
 0x21a   :  { %v200_v41 = vpop.permute.xlu0 %199 }
 0x21b   :  { %v3667_v42 = vmul.f32 %v200_v41, %v191_v29 }
 0x21d   :  { %245 = vrot.lane.b32.xlu1 %v3667_v42, %s3540_s25 }
 0x21e   :  { %v353_v4 = vpop.permute.xlu0 %352 }
 0x28f   :  { %v246_v43 = vpop.permute.xlu1 %245 }
 0x290   :  { %2973 = vmatmul.mubr.msk.f32.vlgmr.msra.gmra.mrb[0].mxu1 %vm247_vm6, %v246_v43 }
 0x291   :  { %3158 = vmatpush3.bf16.msra.mxu1 %v3645_v36  ;;  %2994 = vmatprep.mubr.msk.f32.mxu1 %vm3537_vm5, %v3538_v38 }
 0x292   :  { %3159 = vmatprep.subr.bf16.mxu1 %v3536_v35 }
 0x295   :  { %3161 = vmatpush3.bf16.msra.mxu1 %v3656_v39 }
 0x296   :  { %3168 = vmatprep.subr.bf16.mxu1 %v3536_v35 }
 0x363   :  { %v316_v45 = vpop.f32.mrb[0].mxu1 }
 0x364   :  { %v321_v46 = vrot.slane %v316_v45, 1  ;;  %v324_v47 = vadd.f32 %v316_v45, %v243_v44  ;;  %v2974_v48 = vpop.f32.mrb[1].mxu1 }
 0x366   :  { %v325_v50 = vadd.f32 %v321_v46, %v244_v49  ;;  %v2822_v51 = vmul.f32 -1.442695, %v324_v47 }
 0x368   :  { %3269 = vpow2.f32 %v2822_v51  ;;  %v2823_v52 = vmul.f32 -1.442695, %v325_v50 }
 0x36a   :  { %3271 = vpow2.f32 %v2823_v52 }
 0x36b   :  { %3273 = vtanh.f32 %v325_v50  ;;  %v574_v50 = vld [vmem:[#allocation2 + $0x3] sm:$0x1] }
 0x372   :  { %v3270_v53 = vpop.eup %3269 }
 0x373   :  { %v332_v55 = vadd.f32 1.0, %v3270_v53 }
 0x374   :  { %v3272_v54 = vpop.eup %3271 }
 0x375   :  { %v333_v56 = vadd.f32 1.0, %v3272_v54  ;;  %v3274_v57 = vpop.eup %3273 }
 0x376   :  { %v342_v58 = vrot.slane %v3274_v57, 7 }
 0x377   :  { %3275 = vrcp.f32 %v333_v56 }
 0x378   :  { %3277 = vtanh.f32 %v324_v47 }
 0x379   :  { %3279 = vrcp.f32 %v332_v55  ;;  %v575_v55 = vld [vmem:[#allocation2 + $0xb] sm:$0x1] }
 0x381   :  { %v3276_v59 = vpop.eup %3275 }
 0x382   :  { %v3278_v60 = vpop.eup %3277  ;;  %v347_v61 = vrot.slane %v3276_v59, 7 }
 0x383   :  { %v3280_v62 = vpop.eup %3279  ;;  %v343_v63 = vsel %vm183_vm3, %v342_v58, %v3278_v60 }
 0x384   :  { %v348_v0 = vsel %vm183_vm3, %v347_v61, %v3280_v62 }
 0x385   :  { %v350_v1 = vsel %vm3626_vm4, %v343_v63, %v348_v0 }
 0x386   :  { %357 = vrot.lane.b32.xlu1 %v350_v1, %s3535_s1  ;;  %v355_v5 = vmul.f32 %v353_v4, %v350_v1 }
 0x3f8   :  { %v358_v2 = vpop.permute.xlu1 %357 }
 0x3f9   :  { %v360_v3 = vmul.f32 %v358_v2, %v350_v1 }
 0x3fb   :  { %362 = vrot.lane.b32.xlu1 %v360_v3, %s3540_s25 }
 0x46d   :  { %v363_v6 = vpop.permute.xlu1 %362 }
 0x46e   :  { %v365_v7 = vadd.f32 %v363_v6, %v355_v5 }
 0x470   :  { %3281 = vtanh.f32 %v365_v7 }
 0x47a   :  { %v3282_v8 = vpop.eup %3281 }
 0x47b   :  { %368 = vrot.lane.b32.xlu0 %v3282_v8, %s3535_s1 }
 0x4ed   :  { %v369_v9 = vpop.permute.xlu0 %368 }
 0x4ee   :  { %v3685_v10 = vmul.f32 %v369_v9, %v350_v1 }
 0x4f0   :  { %413 = vrot.lane.b32.xlu1 %v3685_v10, %s3540_s25 }
 0x562   :  { %v414_v11 = vpop.permute.xlu1 %413 }
 0x563   :  { %2984 = vmatmul.mubr.msk.f32.vlgmr.msra.gmra.mrb[2].mxu0 %vm247_vm6, %v414_v11 }
 0x564   :  { %3164 = vmatpush3.bf16.msra.mxu0 %v3645_v36  ;;  %3005 = vmatprep.mubr.msk.f32.mxu0 %vm3537_vm5, %v3538_v38 }
 0x565   :  { %3165 = vmatprep.subr.bf16.mxu0 %v3536_v35 }
 0x568   :  { %3167 = vmatpush3.bf16.msra.mxu0 %v3656_v39 }
 0x569   :  { %3174 = vmatprep.subr.bf16.mxu0 %v3536_v35 }
 0x636   :  { %v483_v13 = vpop.f32.mrb[2].mxu0 }
 0x637   :  { %v488_v14 = vrot.slane %v483_v13, 1  ;;  %v491_v15 = vadd.f32 %v483_v13, %v411_v12  ;;  %v2985_v16 = vpop.f32.mrb[3].mxu0 }
 0x639   :  { %v492_v19 = vadd.f32 %v488_v14, %v412_v17  ;;  %v2825_v20 = vmul.f32 -1.442695, %v491_v15 }
 0x63b   :  { %3283 = vpow2.f32 %v2825_v20  ;;  %v2826_v21 = vmul.f32 -1.442695, %v492_v19 }
 0x63d   :  { %3285 = vpow2.f32 %v2826_v21 }
 0x63e   :  { %3287 = vtanh.f32 %v492_v19  ;;  %v737_v19 = vld [vmem:[#allocation2 + $0x4] sm:$0x1] }
 0x645   :  { %v3284_v22 = vpop.eup %3283 }
 0x646   :  { %v499_v24 = vadd.f32 1.0, %v3284_v22 }
 0x647   :  { %v3286_v23 = vpop.eup %3285 }
 0x648   :  { %v500_v26 = vadd.f32 1.0, %v3286_v23  ;;  %v3288_v27 = vpop.eup %3287 }
 0x649   :  { %v509_v28 = vrot.slane %v3288_v27, 7 }
 0x64a   :  { %3289 = vrcp.f32 %v500_v26 }
 0x64b   :  { %3291 = vtanh.f32 %v491_v15 }
 0x64c   :  { %3293 = vrcp.f32 %v499_v24  ;;  %v738_v24 = vld [vmem:[#allocation2 + $0xc] sm:$0x1] }
 0x654   :  { %v3290_v29 = vpop.eup %3289 }
 0x655   :  { %v3292_v30 = vpop.eup %3291  ;;  %v514_v31 = vrot.slane %v3290_v29, 7 }
 0x656   :  { %v3294_v32 = vpop.eup %3293  ;;  %v510_v33 = vsel %vm183_vm3, %v509_v28, %v3292_v30 }
 0x657   :  { %v515_v34 = vsel %vm183_vm3, %v514_v31, %v3294_v32 }
 0x658   :  { %v517_v37 = vsel %vm3626_vm4, %v510_v33, %v515_v34 }
 0x659   :  { %520 = vrot.lane.b32.xlu0 %v517_v37, %s3535_s1  ;;  %v518_v43 = vmul.f32 %v517_v37, %v365_v7 }
 0x6cb   :  { %v521_v40 = vpop.permute.xlu0 %520 }
 0x6cc   :  { %v523_v41 = vmul.f32 %v521_v40, %v517_v37 }
 0x6ce   :  { %525 = vrot.lane.b32.xlu1 %v523_v41, %s3540_s25 }
 0x740   :  { %v526_v44 = vpop.permute.xlu1 %525 }
 0x741   :  { %v528_v45 = vadd.f32 %v526_v44, %v518_v43 }
 0x743   :  { %3295 = vtanh.f32 %v528_v45 }
 0x74d   :  { %v3296_v46 = vpop.eup %3295 }
 0x74e   :  { %531 = vrot.lane.b32.xlu0 %v3296_v46, %s3535_s1 }
 0x7c0   :  { %v532_v47 = vpop.permute.xlu0 %531 }
 0x7c1   :  { %v3703_v48 = vmul.f32 %v532_v47, %v517_v37 }
 0x7c3   :  { %576 = vrot.lane.b32.xlu1 %v3703_v48, %s3540_s25 }
 0x835   :  { %v577_v49 = vpop.permute.xlu1 %576 }
 0x836   :  { %2995 = vmatmul.mubr.msk.f32.vlgmr.msra.gmra.mrb[2].mxu1 %vm247_vm6, %v577_v49 }
 0x837   :  { %3170 = vmatpush3.bf16.msra.mxu1 %v3645_v36  ;;  %3016 = vmatprep.mubr.msk.f32.mxu1 %vm3537_vm5, %v3538_v38 }
 0x838   :  { %3171 = vmatprep.subr.bf16.mxu1 %v3536_v35 }
 0x83b   :  { %3173 = vmatpush3.bf16.msra.mxu1 %v3656_v39 }
 0x83c   :  { %3180 = vmatprep.subr.bf16.mxu1 %v3536_v35 }
 0x909   :  { %v646_v51 = vpop.f32.mrb[2].mxu1 }
 0x90a   :  { %v651_v52 = vrot.slane %v646_v51, 1  ;;  %v654_v53 = vadd.f32 %v646_v51, %v574_v50  ;;  %v2996_v54 = vpop.f32.mrb[3].mxu1 }
 0x90c   :  { %v655_v56 = vadd.f32 %v651_v52, %v575_v55  ;;  %v2828_v57 = vmul.f32 -1.442695, %v654_v53 }
 0x90e   :  { %3297 = vpow2.f32 %v2828_v57  ;;  %v2829_v58 = vmul.f32 -1.442695, %v655_v56  ;;  %v900_v57 = vld [vmem:[#allocation2 + $0x5] sm:$0x1] }
 0x910   :  { %3299 = vpow2.f32 %v2829_v58 }
 0x911   :  { %3301 = vtanh.f32 %v655_v56 }
 0x918   :  { %v3298_v59 = vpop.eup %3297 }
 0x919   :  { %v662_v61 = vadd.f32 1.0, %v3298_v59 }
 0x91a   :  { %v3300_v60 = vpop.eup %3299 }
 0x91b   :  { %v663_v62 = vadd.f32 1.0, %v3300_v60  ;;  %v3302_v63 = vpop.eup %3301 }
 0x91c   :  { %v672_v0 = vrot.slane %v3302_v63, 7 }
 0x91d   :  { %3303 = vrcp.f32 %v663_v62  ;;  %v901_v62 = vld [vmem:[#allocation2 + $0xd] sm:$0x1] }
 0x91e   :  { %3305 = vtanh.f32 %v654_v53 }
 0x91f   :  { %3307 = vrcp.f32 %v662_v61 }
 0x927   :  { %v3304_v1 = vpop.eup %3303 }
 0x928   :  { %v3306_v2 = vpop.eup %3305  ;;  %v677_v3 = vrot.slane %v3304_v1, 7 }
 0x929   :  { %v3308_v4 = vpop.eup %3307  ;;  %v673_v5 = vsel %vm183_vm3, %v672_v0, %v3306_v2 }
 0x92a   :  { %v678_v6 = vsel %vm183_vm3, %v677_v3, %v3308_v4 }
 0x92b   :  { %v680_v7 = vsel %vm3626_vm4, %v673_v5, %v678_v6 }
 0x92c   :  { %683 = vrot.lane.b32.xlu0 %v680_v7, %s3535_s1  ;;  %v681_v11 = vmul.f32 %v680_v7, %v528_v45 }
 0x99e   :  { %v684_v8 = vpop.permute.xlu0 %683 }
 0x99f   :  { %v686_v9 = vmul.f32 %v684_v8, %v680_v7 }
 0x9a1   :  { %688 = vrot.lane.b32.xlu1 %v686_v9, %s3540_s25 }
 0xa13   :  { %v689_v12 = vpop.permute.xlu1 %688 }
 0xa14   :  { %v691_v13 = vadd.f32 %v689_v12, %v681_v11 }
 0xa16   :  { %3309 = vtanh.f32 %v691_v13 }
 0xa20   :  { %v3310_v14 = vpop.eup %3309 }
 0xa21   :  { %694 = vrot.lane.b32.xlu0 %v3310_v14, %s3535_s1 }
 0xa93   :  { %v695_v15 = vpop.permute.xlu0 %694 }
 0xa94   :  { %v3721_v16 = vmul.f32 %v695_v15, %v680_v7 }
 0xa96   :  { %739 = vrot.lane.b32.xlu1 %v3721_v16, %s3540_s25 }
 0xb08   :  { %v740_v17 = vpop.permute.xlu1 %739 }
 0xb09   :  { %3006 = vmatmul.mubr.msk.f32.vlgmr.msra.gmra.mrb[4].mxu0 %vm247_vm6, %v740_v17 }
 0xb0a   :  { %3176 = vmatpush3.bf16.msra.mxu0 %v3645_v36  ;;  %3027 = vmatprep.mubr.msk.f32.mxu0 %vm3537_vm5, %v3538_v38 }
 0xb0b   :  { %3177 = vmatprep.subr.bf16.mxu0 %v3536_v35 }
 0xb0e   :  { %3179 = vmatpush3.bf16.msra.mxu0 %v3656_v39 }
 0xbdc   :  { %v809_v20 = vpop.f32.mrb[4].mxu0 }
 0xbdd   :  { %v814_v21 = vrot.slane %v809_v20, 1  ;;  %v817_v22 = vadd.f32 %v809_v20, %v737_v19  ;;  %v3007_v23 = vpop.f32.mrb[5].mxu0 }
 0xbdf   :  { %v818_v26 = vadd.f32 %v814_v21, %v738_v24  ;;  %v2831_v27 = vmul.f32 -1.442695, %v817_v22 }
 0xbe1   :  { %3311 = vpow2.f32 %v2831_v27  ;;  %v2832_v28 = vmul.f32 -1.442695, %v818_v26 }
 0xbe3   :  { %3313 = vpow2.f32 %v2832_v28 }
 0xbe4   :  { %3315 = vtanh.f32 %v818_v26  ;;  %v1063_v26 = vld [vmem:[#allocation2 + $0x6] sm:$0x1] }
 0xbeb   :  { %v3312_v29 = vpop.eup %3311 }
 0xbec   :  { %v825_v31 = vadd.f32 1.0, %v3312_v29 }
 0xbed   :  { %v3314_v30 = vpop.eup %3313 }
 0xbee   :  { %v826_v32 = vadd.f32 1.0, %v3314_v30  ;;  %v3316_v33 = vpop.eup %3315 }
 0xbef   :  { %v835_v34 = vrot.slane %v3316_v33, 7 }
 0xbf0   :  { %3317 = vrcp.f32 %v826_v32 }
 0xbf1   :  { %3319 = vtanh.f32 %v817_v22 }
 0xbf2   :  { %3321 = vrcp.f32 %v825_v31  ;;  %v1064_v31 = vld [vmem:[#allocation2 + $0xe] sm:$0x1] }
 0xbfa   :  { %v3318_v37 = vpop.eup %3317 }
 0xbfb   :  { %v3320_v40 = vpop.eup %3319  ;;  %v840_v41 = vrot.slane %v3318_v37, 7 }
 0xbfc   :  { %v3322_v43 = vpop.eup %3321  ;;  %v836_v44 = vsel %vm183_vm3, %v835_v34, %v3320_v40 }
 0xbfd   :  { %v841_v45 = vsel %vm183_vm3, %v840_v41, %v3322_v43 }
 0xbfe   :  { %v843_v46 = vsel %vm3626_vm4, %v836_v44, %v841_v45 }
 0xbff   :  { %846 = vrot.lane.b32.xlu0 %v843_v46, %s3535_s1  ;;  %v844_v50 = vmul.f32 %v843_v46, %v691_v13 }
 0xc71   :  { %v847_v47 = vpop.permute.xlu0 %846 }
 0xc72   :  { %v849_v49 = vmul.f32 %v847_v47, %v843_v46 }
 0xc74   :  { %851 = vrot.lane.b32.xlu1 %v849_v49, %s3540_s25 }
 0xce6   :  { %v852_v51 = vpop.permute.xlu1 %851 }
 0xce7   :  { %v854_v52 = vadd.f32 %v852_v51, %v844_v50 }
 0xce9   :  { %3323 = vtanh.f32 %v854_v52 }
 0xcf3   :  { %v3324_v53 = vpop.eup %3323 }
 0xcf4   :  { %857 = vrot.lane.b32.xlu0 %v3324_v53, %s3535_s1 }
 0xd66   :  { %v858_v54 = vpop.permute.xlu0 %857 }
 0xd67   :  { %v3738_v55 = vmul.f32 %v858_v54, %v843_v46 }
 0xd69   :  { %902 = vrot.lane.b32.xlu1 %v3738_v55, %s3540_s25 }
 0xddb   :  { %v903_v56 = vpop.permute.xlu1 %902 }
 0xddc   :  { %3017 = vmatmul.mubr.msk.f32.vlgmr.msra.gmra.mrb[4].mxu1 %vm247_vm6, %v903_v56 }
 0xddd   :  { %3182 = vmatpush3.bf16.msra.mxu1 %v3645_v36  ;;  %3038 = vmatprep.mubr.msk.f32.mxu1 %vm3537_vm5, %v3538_v38 }
 0xdde   :  { %3183 = vmatprep.subr.bf16.mxu1 %v3536_v35 }
 0xde1   :  { %3185 = vmatpush3.bf16.msra.mxu1 %v3656_v39 }
 0xde2   :  { %3194 = vmatprep.subr.bf16.mxu1 %v3536_v35 }
 0xeaf   :  { %v972_v58 = vpop.f32.mrb[4].mxu1 }
 0xeb0   :  { %v977_v59 = vrot.slane %v972_v58, 1  ;;  %v980_v60 = vadd.f32 %v972_v58, %v900_v57  ;;  %v3018_v61 = vpop.f32.mrb[5].mxu1 }
 0xeb2   :  { %v981_v63 = vadd.f32 %v977_v59, %v901_v62  ;;  %v2834_v0 = vmul.f32 -1.442695, %v980_v60 }
 0xeb4   :  { %3325 = vpow2.f32 %v2834_v0  ;;  %v2835_v1 = vmul.f32 -1.442695, %v981_v63  ;;  %v1226_v0 = vld [vmem:[#allocation2 + $0x7] sm:$0x1] }
 0xeb6   :  { %3327 = vpow2.f32 %v2835_v1 }
 0xeb7   :  { %3329 = vtanh.f32 %v981_v63 }
 0xebe   :  { %v3326_v36 = vpop.eup %3325 }
 0xebf   :  { %v988_v3 = vadd.f32 1.0, %v3326_v36 }
 0xec0   :  { %v3328_v2 = vpop.eup %3327 }
 0xec1   :  { %v989_v4 = vadd.f32 1.0, %v3328_v2  ;;  %v3330_v39 = vpop.eup %3329 }
 0xec2   :  { %v998_v5 = vrot.slane %v3330_v39, 7 }
 0xec3   :  { %3331 = vrcp.f32 %v989_v4  ;;  %v1227_v4 = vld [vmem:[#allocation2 + $0xf] sm:$0x1] }
 0xec4   :  { %3333 = vtanh.f32 %v980_v60 }
 0xec5   :  { %3335 = vrcp.f32 %v988_v3 }
 0xecd   :  { %v3332_v6 = vpop.eup %3331 }
 0xece   :  { %v3334_v7 = vpop.eup %3333  ;;  %v1003_v8 = vrot.slane %v3332_v6, 7 }
 0xecf   :  { %v3336_v9 = vpop.eup %3335  ;;  %v999_v11 = vsel %vm183_vm3, %v998_v5, %v3334_v7 }
 0xed0   :  { %v1004_v12 = vsel %vm183_vm3, %v1003_v8, %v3336_v9 }
 0xed1   :  { %v1006_v13 = vsel %vm3626_vm4, %v999_v11, %v1004_v12 }
 0xed2   :  { %1009 = vrot.lane.b32.xlu0 %v1006_v13, %s3535_s1  ;;  %v1007_v17 = vmul.f32 %v1006_v13, %v854_v52 }
 0xf44   :  { %v1010_v14 = vpop.permute.xlu0 %1009 }
 0xf45   :  { %v1012_v15 = vmul.f32 %v1010_v14, %v1006_v13 }
 0xf47   :  { %1014 = vrot.lane.b32.xlu1 %v1012_v15, %s3540_s25 }
 0xfb9   :  { %v1015_v19 = vpop.permute.xlu1 %1014 }
 0xfba   :  { %v1017_v20 = vadd.f32 %v1015_v19, %v1007_v17 }
 0xfbc   :  { %3337 = vtanh.f32 %v1017_v20 }
 0xfc6   :  { %v3338_v21 = vpop.eup %3337 }
 0xfc7   :  { %1020 = vrot.lane.b32.xlu0 %v3338_v21, %s3535_s1 }
0x1039   :  { %v1021_v22 = vpop.permute.xlu0 %1020 }
0x103a   :  { %v3756_v23 = vmul.f32 %v1021_v22, %v1006_v13 }
0x103c   :  { %1065 = vrot.lane.b32.xlu1 %v3756_v23, %s3540_s25 }
0x10ae   :  { %v1066_v24 = vpop.permute.xlu1 %1065 }
0x10af   :  { %3028 = vmatmul.mubr.msk.f32.vlgmr.msra.gmra.mrb[6].mxu0 %vm247_vm6, %v1066_v24  ;;  %v3541_v24 = vmov 1966171168  }
0x1182   :  { %v1135_v27 = vpop.f32.mrb[6].mxu0 }
0x1183   :  { %v1140_v28 = vrot.slane %v1135_v27, 1  ;;  %v1143_v29 = vadd.f32 %v1135_v27, %v1063_v26  ;;  %v3029_v30 = vpop.f32.mrb[7].mxu0  ;;  %v205_v26 = vunpack.c.l.s4 %v3541_v24 }
0x1185   :  { %v1144_v32 = vadd.f32 %v1140_v28, %v1064_v31  ;;  %v2837_v33 = vmul.f32 -1.442695, %v1143_v29  ;;  %v206_v27 = vunpack.c.0.s8 %v205_v26  ;;  %v208_v28 = vshrl.u32 %v60_v18, 7 }
0x1187   :  { %3339 = vpow2.f32 %v2837_v33  ;;  %v2838_v34 = vmul.f32 -1.442695, %v1144_v32 }
0x1189   :  { %3341 = vpow2.f32 %v2838_v34 }
0x118a   :  { %3343 = vtanh.f32 %v1144_v32  ;;  %v3788_v32 = vsub.s32 0, %v208_v28 }
0x1191   :  { %v3340_v37 = vpop.eup %3339 }
0x1192   :  { %v1151_v41 = vadd.f32 1.0, %v3340_v37 }
0x1193   :  { %v3342_v40 = vpop.eup %3341 }
0x1194   :  { %v1152_v43 = vadd.f32 1.0, %v3342_v40  ;;  %v3344_v44 = vpop.eup %3343 }
0x1195   :  { %v1161_v45 = vrot.slane %v3344_v44, 7 }
0x1196   :  { %3345 = vrcp.f32 %v1152_v43 }
0x1197   :  { %3347 = vtanh.f32 %v1143_v29  ;;  %v3784_v29 = vsub.s32 %v206_v27, %v208_v28  ;;  %v1389_v28 = vld [vmem:[%s4135_s4] sm:$0xff] }
0x1198   :  { %3349 = vrcp.f32 %v1151_v41 }
0x1199   :  { %v210_v30 = vrot.slane %v3667_v42, %v3784_v29  ;;  %v542_v34 = vrot.slane %v3703_v48, %v3784_v29  ;;  %v868_v18 = vrot.slane %v3738_v55, %v3784_v29 }
0x119b   :  { %v218_v33 = vrot.slane %v210_v30, %v3784_v29  ;;  %v550_v40 = vrot.slane %v542_v34, %v3784_v29  ;;  %v876_v42 = vrot.slane %v868_v18, %v3784_v29  ;;  %v211_v48 = vcombine.high %v210_v30, %v210_v30  ;;  %v1390_v30 = vld [vmem:[%s4135_s4 + $0x8] sm:$0xff] }
0x119c   :  { %v543_v55 = vcombine.high %v542_v34, %v542_v34  ;;  %v3186_v34 = vpack.c.bf16 %v1390_v30, %v1389_v28 }
0x119d   :  { %v229_v41 = vrot.slane %v218_v33, %v3788_v32  ;;  %v561_v44 = vrot.slane %v550_v40, %v3788_v32 }
0x119e   :  { %3187 = vmatprep.subr.bf16.mxu0 %v3186_v34 }
0x119f   :  { %3189 = vmatpush3.bf16.msra.mxu0 %v3186_v34 }
0x11a0   :  { %v3346_v46 = vpop.eup %3345 }
0x11a1   :  { %v3348_v47 = vpop.eup %3347  ;;  %v1166_v49 = vrot.slane %v3346_v46, 7  ;;  %v887_v46 = vrot.slane %v876_v42, %v3788_v32 }
0x11a2   :  { %v3350_v50 = vpop.eup %3349  ;;  %v1162_v51 = vsel %vm183_vm3, %v1161_v45, %v3348_v47 }
0x11a3   :  { %v1167_v52 = vsel %vm183_vm3, %v1166_v49, %v3350_v50  ;;  %v225_v49 = vrot.slane %v211_v48, %v3784_v29  ;;  %v869_v50 = vcombine.high %v868_v18, %v868_v18 }
0x11a4   :  { %v1169_v53 = vsel %vm3626_vm4, %v1162_v51, %v1167_v52  ;;  %v557_v52 = vrot.slane %v543_v55, %v3784_v29 }
0x11a5   :  { %1172 = vrot.lane.b32.xlu0 %v1169_v53, %s3535_s1  ;;  %v1170_v57 = vmul.f32 %v1169_v53, %v1017_v20  ;;  %v233_v51 = vrot.slane %v225_v49, %v3788_v32 }
0x1217   :  { %v1173_v54 = vpop.permute.xlu0 %1172 }
0x1218   :  { %v1175_v56 = vmul.f32 %v1173_v54, %v1169_v53  ;;  %v565_v54 = vrot.slane %v557_v52, %v3788_v32 }
0x121a   :  { %1177 = vrot.lane.b32.xlu1 %v1175_v56, %s3540_s25  ;;  %v883_v56 = vrot.slane %v869_v50, %v3784_v29 }
0x128c   :  { %v1178_v58 = vpop.permute.xlu1 %1177 }
0x128d   :  { %v3767_v59 = vadd.f32 %v1178_v58, %v1170_v57  ;;  %v891_v57 = vrot.slane %v883_v56, %v3788_v32 }
0x128f   :  { %3351 = vtanh.f32 %v3767_v59 }
0x1299   :  { %v3352_v60 = vpop.eup %3351 }
0x129a   :  { %1183 = vrot.lane.b32.xlu0 %v3352_v60, %s3535_s1 }
0x130c   :  { %v1184_v61 = vpop.permute.xlu0 %1183 }
0x130d   :  { %v1186_v62 = vmul.f32 %v1184_v61, %v1169_v53 }
0x130f   :  { %1228 = vrot.lane.b32.xlu1 %v1186_v62, %s3540_s25  ;;  %v1194_v43 = vrot.slane %v1186_v62, %v3784_v29 }
0x1311   :  { %v1202_v45 = vrot.slane %v1194_v43, %v3784_v29  ;;  %v1195_v53 = vcombine.high %v1194_v43, %v1194_v43 }
0x1313   :  { %v1213_v47 = vrot.slane %v1202_v45, %v3788_v32  ;;  %v1209_v58 = vrot.slane %v1195_v53, %v3784_v29 }
0x1315   :  { %v1217_v60 = vrot.slane %v1209_v58, %v3788_v32 }
0x1381   :  { %v1229_v63 = vpop.permute.xlu1 %1228 }
0x1382   :  { %3039 = vmatmul.mubr.msk.f32.vlgmr.msra.gmra.mrb[6].mxu1 %vm247_vm6, %v1229_v63 }
0x1383   :  { %3060 = vmatprep.mubr.msk.f32.mxu1 %vm3537_vm5, %v3538_v38 }
0x1455   :  { %v1298_v1 = vpop.f32.mrb[6].mxu1 }
0x1456   :  { %v1303_v36 = vrot.slane %v1298_v1, 1  ;;  %v1306_v2 = vadd.f32 %v1298_v1, %v1226_v0  ;;  %v3040_v3 = vpop.f32.mrb[7].mxu1  ;;  %v379_v1 = vrot.slane %v3685_v10, %v3784_v29 }
0x1457   :  { %v705_v3 = vrot.slane %v3721_v16, %v3784_v29 }
0x1458   :  { %v1307_v39 = vadd.f32 %v1303_v36, %v1227_v4  ;;  %v2840_v5 = vmul.f32 -1.442695, %v1306_v2 }
0x145a   :  { %3353 = vpow2.f32 %v2840_v5  ;;  %v2841_v6 = vmul.f32 -1.442695, %v1307_v39  ;;  %v1031_v5 = vrot.slane %v3756_v23, %v3784_v29 }
0x145c   :  { %3355 = vpow2.f32 %v2841_v6  ;;  %v1039_v16 = vrot.slane %v1031_v5, %v3784_v29 }
0x145d   :  { %3357 = vtanh.f32 %v1307_v39  ;;  %v713_v39 = vrot.slane %v705_v3, %v3784_v29 }
0x145e   :  { %v1050_v23 = vrot.slane %v1039_v16, %v3788_v32 }
0x1464   :  { %v3354_v7 = vpop.eup %3353 }
0x1465   :  { %v1314_v9 = vadd.f32 1.0, %v3354_v7  ;;  %v380_v7 = vcombine.high %v379_v1, %v379_v1 }
0x1466   :  { %v3356_v8 = vpop.eup %3355 }
0x1467   :  { %v1315_v11 = vadd.f32 1.0, %v3356_v8  ;;  %v3358_v12 = vpop.eup %3357 }
0x1468   :  { %v1324_v13 = vrot.slane %v3358_v12, 7 }
0x1469   :  { %3359 = vrcp.f32 %v1315_v11  ;;  %v706_v11 = vcombine.high %v705_v3, %v705_v3 }
0x146a   :  { %3361 = vtanh.f32 %v1306_v2  ;;  %v387_v2 = vrot.slane %v379_v1, %v3784_v29 }
0x146b   :  { %3363 = vrcp.f32 %v1314_v9  ;;  %v724_v9 = vrot.slane %v713_v39, %v3788_v32 }
0x146c   :  { %v398_v6 = vrot.slane %v387_v2, %v3788_v32 }
0x1473   :  { %v3360_v14 = vpop.eup %3359 }
0x1474   :  { %v3362_v15 = vpop.eup %3361  ;;  %v1329_v17 = vrot.slane %v3360_v14, 7  ;;  %v1032_v14 = vcombine.high %v1031_v5, %v1031_v5 }
0x1475   :  { %v3364_v19 = vpop.eup %3363  ;;  %v1325_v20 = vsel %vm183_vm3, %v1324_v13, %v3362_v15  ;;  %v394_v13 = vrot.slane %v380_v7, %v3784_v29 }
0x1476   :  { %v1330_v21 = vsel %vm183_vm3, %v1329_v17, %v3364_v19  ;;  %v720_v19 = vrot.slane %v706_v11, %v3784_v29  ;;  %v1046_v24 = vrot.slane %v1032_v14, %v3784_v29 }
0x1477   :  { %v3779_v22 = vsel %vm3626_vm4, %v1325_v20, %v1330_v21  ;;  %v402_v17 = vrot.slane %v394_v13, %v3788_v32  ;;  %v1395_v13 = vld [vmem:[#allocation6 + $0x10] sm:$0xff] }
0x1478   :  { %1335 = vrot.lane.b32.xlu0 %v3779_v22, %s3535_s1  ;;  %v1333_v61 = vmul.f32 %v3779_v22, %v3767_v59  ;;  %v728_v21 = vrot.slane %v720_v19, %v3788_v32  ;;  %v1054_v26 = vrot.slane %v1046_v24, %v3788_v32 }
0x14ea   :  { %v1336_v31 = vpop.permute.xlu0 %1335 }
0x14eb   :  { %v1338_v37 = vmul.f32 %v1336_v31, %v3779_v22  ;;  %v1391_v31 = vld [vmem:[%s4135_s4 + $0x10] sm:$0xff] }
0x14ed   :  { %1340 = vrot.lane.b32.xlu1 %v1338_v37, %s3540_s25  ;;  %v1392_v37 = vld [vmem:[%s4135_s4 + $0x18] sm:$0xff] }
0x14ee   :  { %v3190_v40 = vpack.c.bf16 %v1392_v37, %v1391_v31 }
0x14f0   :  { %3191 = vmatprep.subr.bf16.mxu0 %v3190_v40 }
0x14f1   :  { %234 = vrot.lane.b32.xlu1 %v229_v41, %s3540_s25  ;;  %3193 = vmatpush3.bf16.msra.mxu0 %v3190_v40 }
0x14f2   :  { %3200 = vmatprep.subr.bf16.mxu0 %v3536_v35 }
0x14f5   :  { %566 = vrot.lane.b32.xlu1 %v561_v44, %s3540_s25 }
0x14f9   :  { %892 = vrot.lane.b32.xlu1 %v887_v46, %s3540_s25 }
0x14fd   :  { %1218 = vrot.lane.b32.xlu1 %v1213_v47, %s3540_s25 }
0x1501   :  { %236 = vrot.lane.b32.xlu1 %v233_v51, %s3540_s25 }
0x1505   :  { %568 = vrot.lane.b32.xlu1 %v565_v54, %s3540_s25  ;;  %v2842_v54 = vld [vmem:[%s4137_s6] ss:$0 sm:$0xff] }
0x1509   :  { %894 = vrot.lane.b32.xlu1 %v891_v57, %s3540_s25 }
0x150d   :  { %1220 = vrot.lane.b32.xlu1 %v1217_v60, %s3540_s25 }
0x155f   :  { %v1341_v62 = vpop.permute.xlu1 %1340 }
0x1560   :  { %v1343_v63 = vadd.f32 %v1341_v62, %v1333_v61 }
0x1562   :  { %3365 = vtanh.f32 %v1343_v63 }
0x1563   :  { %v235_v0 = vpop.permute.xlu1 %234 }
0x1564   :  { %241 = vst.msk [vmem:[#allocation3] sm:$0x1] %vm240_vm7, %v235_v0 }
0x1567   :  { %v567_v36 = vpop.permute.xlu1 %566 }
0x1568   :  { %572 = vst.msk [vmem:[#allocation3 + $0x2] sm:$0x1] %vm240_vm7, %v567_v36 }
0x156b   :  { %v893_v4 = vpop.permute.xlu1 %892 }
0x156c   :  { %v3366_v59 = vpop.eup %3365  ;;  %898 = vst.msk [vmem:[#allocation3 + $0x4] sm:$0x1] %vm240_vm7, %v893_v4 }
0x156d   :  { %1346 = vrot.lane.b32.xlu0 %v3366_v59, %s3535_s1 }
0x156f   :  { %v1219_v10 = vpop.permute.xlu1 %1218 }
0x1570   :  { %1224 = vst.msk [vmem:[#allocation3 + $0x6] sm:$0x1] %vm240_vm7, %v1219_v10 }
0x1571   :  { %403 = vrot.lane.b32.xlu0 %v398_v6, %s3540_s25 }
0x1573   :  { %v237_v8 = vpop.permute.xlu1 %236 }
0x1574   :  { %242 = vst.msk [vmem:[#allocation3 + $0x8] sm:$0x1] %vm240_vm7, %v237_v8 }
0x1575   :  { %729 = vrot.lane.b32.xlu0 %v724_v9, %s3540_s25 }
0x1577   :  { %v569_v12 = vpop.permute.xlu1 %568 }
0x1578   :  { %573 = vst.msk [vmem:[#allocation3 + $0xa] sm:$0x1] %vm240_vm7, %v569_v12  ;;  %v1393_v12 = vld [vmem:[#allocation6] sm:$0xff] }
0x1579   :  { %1055 = vrot.lane.b32.xlu0 %v1050_v23, %s3540_s25  ;;  %v1394_v23 = vld [vmem:[#allocation6 + $0x8] sm:$0xff] }
0x157a   :  { %v3897_v14 = vpack.c.bf16 %v1394_v23, %v1393_v12 }
0x157b   :  { %v895_v15 = vpop.permute.xlu1 %894 }
0x157c   :  { %899 = vst.msk [vmem:[#allocation3 + $0xc] sm:$0x1] %vm240_vm7, %v895_v15  ;;  %v1396_v15 = vld [vmem:[#allocation6 + $0x18] sm:$0xff]  ;;  %3196 = vmatpush3.bf16.msra.mxu1 %v3897_v14 }
0x157d   :  { %405 = vrot.lane.b32.xlu0 %v402_v17, %s3540_s25  ;;  %v3900_v17 = vpack.c.bf16 %v1396_v15, %v1395_v13  ;;  %3197 = vmatprep.subr.bf16.mxu1 %v3536_v35 }
0x157f   :  { %v1221_v20 = vpop.permute.xlu1 %1220 }
0x1580   :  { %1225 = vst.msk [vmem:[#allocation3 + $0xe] sm:$0x1] %vm240_vm7, %v1221_v20  ;;  %3199 = vmatpush3.bf16.msra.mxu1 %v3900_v17 }
0x1581   :  { %731 = vrot.lane.b32.xlu0 %v728_v21, %s3540_s25  ;;  %3206 = vmatprep.subr.bf16.mxu1 %v3536_v35 }
0x1585   :  { %1057 = vrot.lane.b32.xlu0 %v1054_v26, %s3540_s25 }
0x15df   :  { %v1347_v27 = vpop.permute.xlu0 %1346 }
0x15e0   :  { %v1349_v33 = vmul.f32 %v1347_v27, %v3779_v22 }
0x15e2   :  { %v1357_v18 = vrot.slane %v1349_v33, %v3784_v29 }
0x15e3   :  { %v404_v41 = vpop.permute.xlu0 %403 }
0x15e4   :  { %v1358_v42 = vcombine.high %v1357_v18, %v1357_v18  ;;  %v1365_v43 = vrot.slane %v1357_v18, %v3784_v29  ;;  %409 = vst.msk [vmem:[#allocation3 + $0x1] sm:$0x1] %vm240_vm7, %v404_v41 }
0x15e6   :  { %v1376_v44 = vrot.slane %v1365_v43, %v3788_v32  ;;  %v1372_v22 = vrot.slane %v1358_v42, %v3784_v29 }
0x15e7   :  { %v730_v48 = vpop.permute.xlu0 %729 }
0x15e8   :  { %735 = vst.msk [vmem:[#allocation3 + $0x3] sm:$0x1] %vm240_vm7, %v730_v48  ;;  %1381 = vrot.lane.b32.xlu0 %v1376_v44, %s3540_s25  ;;  %v1380_v45 = vrot.slane %v1372_v22, %v3788_v32 }
0x15eb   :  { %v1056_v46 = vpop.permute.xlu0 %1055 }
0x15ec   :  { %1061 = vst.msk [vmem:[#allocation3 + $0x5] sm:$0x1] %vm240_vm7, %v1056_v46  ;;  %1383 = vrot.lane.b32.xlu0 %v1380_v45, %s3540_s25 }
0x15ef   :  { %v406_v55 = vpop.permute.xlu0 %405 }
0x15f0   :  { %410 = vst.msk [vmem:[#allocation3 + $0x9] sm:$0x1] %vm240_vm7, %v406_v55 }
0x15f3   :  { %v732_v47 = vpop.permute.xlu0 %731 }
0x15f4   :  { %736 = vst.msk [vmem:[#allocation3 + $0xb] sm:$0x1] %vm240_vm7, %v732_v47 }
0x15f7   :  { %v1058_v49 = vpop.permute.xlu0 %1057 }
0x15f8   :  { %1062 = vst.msk [vmem:[#allocation3 + $0xd] sm:$0x1] %vm240_vm7, %v1058_v49 }
0x165a   :  { %v1382_v50 = vpop.permute.xlu0 %1381 }
0x165b   :  { %1387 = vst.msk [vmem:[#allocation3 + $0x7] sm:$0x1] %vm240_vm7, %v1382_v50 }
0x165e   :  { %v1384_v51 = vpop.permute.xlu0 %1383 }
0x165f   :  { %1388 = vst.msk [vmem:[#allocation3 + $0xf] sm:$0x1] %vm240_vm7, %v1384_v51 }
0x1662   :  { %v1398_v52 = vld [vmem:[#allocation3] sm:$0xff] }
0x1663   :  { %3049 = vmatprep.mubr.msk.f32.mxu0 %vm247_vm6, %v1398_v52 }
0x1666   :  { %v1399_v53 = vld [vmem:[#allocation3 + $0x8] sm:$0xff] }
0x1667   :  { %3050 = vmatmul.mubr.msk.f32.vlgmr.msra.gmra.mrb[8].mxu0 %vm247_vm6, %v1399_v53 }
0x1668   :  { %3071 = vmatprep.mubr.msk.f32.mxu0 %vm3537_vm5, %v3538_v38  ;;  %3202 = vmatpush3.bf16.msra.mxu0 %v3897_v14 }
0x1669   :  { %3203 = vmatprep.subr.bf16.mxu0 %v3536_v35 }
0x166c   :  { %3205 = vmatpush3.bf16.msra.mxu0 %v3900_v17 }
0x166d   :  { %3212 = vmatprep.subr.bf16.mxu0 %v3536_v35 }
0x173a   :  { %v3051_v56 = vpop.f32.mrb[8].mxu0 }
0x173b   :  { %v1484_v57 = vadd.f32 %v3051_v56, %v2842_v54  ;;  %v1478_v58 = vpop.f32.mrb[9].mxu0 }
0x173c   :  { %v1479_v60 = vadd.f32 %v2842_v54, %v1478_v58 }
0x173d   :  { %1488 = vst [vmem:[#allocation2 + $0x8] sm:$0xff] %v1484_v57 }
0x173e   :  { %1487 = vst [vmem:[#allocation2] sm:$0xff] %v1479_v60 }
0x1744   :  { %v1490_v61 = vld [vmem:[#allocation2 + $0x8] sm:$0x1]  ;;  %v1567_v33 = vld [vmem:[#allocation2 + $0x9] sm:$0x1] }
0x1745   :  { %v1489_v62 = vld [vmem:[#allocation2] sm:$0x1]  ;;  %v2846_v63 = vmul.f32 -1.442695, %v1490_v61  ;;  %v1566_v26 = vld [vmem:[#allocation2 + $0x1] sm:$0x1] }
0x1746   :  { %v2845_v0 = vmul.f32 -1.442695, %v1489_v62 }
0x1747   :  { %3367 = vpow2.f32 %v2846_v63  ;;  %v1733_v63 = vld [vmem:[#allocation2 + $0x2] sm:$0x1] }
0x1748   :  { %3369 = vpow2.f32 %v2845_v0 }
0x1749   :  { %3371 = vtanh.f32 %v1490_v61 }
0x174a   :  { %3373 = vtanh.f32 %v1489_v62 }
0x1751   :  { %v3368_v1 = vpop.eup %3367 }
0x1752   :  { %v3370_v36 = vpop.eup %3369  ;;  %v1498_v2 = vadd.f32 1.0, %v3368_v1 }
0x1753   :  { %v1497_v3 = vadd.f32 1.0, %v3370_v36  ;;  %v3372_v4 = vpop.eup %3371 }
0x1754   :  { %3375 = vrcp.f32 %v1498_v2  ;;  %v3374_v59 = vpop.eup %3373  ;;  %v1507_v39 = vrot.slane %v3372_v4, 7 }
0x1755   :  { %3377 = vrcp.f32 %v1497_v3  ;;  %v1734_v3 = vld [vmem:[#allocation2 + $0xa] sm:$0x1] }
0x1756   :  { %v1508_v7 = vsel %vm183_vm3, %v1507_v39, %v3374_v59 }
0x175e   :  { %v3376_v5 = vpop.eup %3375 }
0x175f   :  { %v3378_v10 = vpop.eup %3377  ;;  %v1512_v6 = vrot.slane %v3376_v5, 7 }
0x1761   :  { %v1513_v16 = vsel %vm183_vm3, %v1512_v6, %v3378_v10 }
0x1762   :  { %v1515_v8 = vsel %vm3626_vm4, %v1508_v7, %v1513_v16 }
0x1763   :  { %1517 = vrot.lane.b32.xlu1 %v1515_v8, %s3535_s1 }
0x17d5   :  { %v1518_v9 = vpop.permute.xlu1 %1517 }
0x17d6   :  { %v1520_v11 = vmul.f32 %v1518_v9, %v1515_v8 }
0x17d8   :  { %3379 = vtanh.f32 %v1520_v11 }
0x17e2   :  { %v3380_v19 = vpop.eup %3379 }
0x17e3   :  { %1523 = vrot.lane.b32.xlu0 %v3380_v19, %s3539_s2 }
0x1855   :  { %v1524_v20 = vpop.permute.xlu0 %1523 }
0x1856   :  { %v3910_v21 = vmul.f32 %v1524_v20, %v1515_v8 }
0x1858   :  { %1568 = vrot.lane.b32.xlu1 %v3910_v21, %s3540_s25 }
0x185c   :  { %1674 = vrot.lane.b32.xlu1 %v1520_v11, %s3540_s25 }
0x18ca   :  { %v1569_v24 = vpop.permute.xlu1 %1568 }
0x18cb   :  { %3061 = vmatmul.mubr.msk.f32.vlgmr.msra.gmra.mrb[8].mxu1 %vm247_vm6, %v1569_v24 }
0x18cc   :  { %3208 = vmatpush3.bf16.msra.mxu1 %v3897_v14  ;;  %3082 = vmatprep.mubr.msk.f32.mxu1 %vm3537_vm5, %v3538_v38 }
0x18cd   :  { %3209 = vmatprep.subr.bf16.mxu1 %v3536_v35 }
0x18ce   :  { %v1675_v53 = vpop.permute.xlu1 %1674 }
0x18d0   :  { %3211 = vmatpush3.bf16.msra.mxu1 %v3900_v17 }
0x18d1   :  { %3218 = vmatprep.subr.bf16.mxu1 %v3536_v35 }
0x199e   :  { %v1638_v27 = vpop.f32.mrb[8].mxu1 }
0x199f   :  { %v1643_v28 = vrot.slane %v1638_v27, 1  ;;  %v1646_v30 = vadd.f32 %v1638_v27, %v1566_v26  ;;  %v3062_v31 = vpop.f32.mrb[9].mxu1 }
0x19a1   :  { %v1647_v34 = vadd.f32 %v1643_v28, %v1567_v33  ;;  %v2848_v37 = vmul.f32 -1.442695, %v1646_v30 }
0x19a3   :  { %3381 = vpow2.f32 %v2848_v37  ;;  %v2849_v40 = vmul.f32 -1.442695, %v1647_v34  ;;  %v1896_v37 = vld [vmem:[#allocation2 + $0x3] sm:$0x1] }
0x19a5   :  { %3383 = vpow2.f32 %v2849_v40 }
0x19a6   :  { %3385 = vtanh.f32 %v1647_v34 }
0x19ad   :  { %v3382_v18 = vpop.eup %3381 }
0x19ae   :  { %v1654_v42 = vadd.f32 1.0, %v3382_v18 }
0x19af   :  { %v3384_v41 = vpop.eup %3383 }
0x19b0   :  { %v1655_v43 = vadd.f32 1.0, %v3384_v41  ;;  %v3386_v44 = vpop.eup %3385 }
0x19b1   :  { %v1664_v22 = vrot.slane %v3386_v44, 7 }
0x19b2   :  { %3387 = vrcp.f32 %v1655_v43  ;;  %v1897_v43 = vld [vmem:[#allocation2 + $0xb] sm:$0x1] }
0x19b3   :  { %3389 = vtanh.f32 %v1646_v30 }
0x19b4   :  { %3391 = vrcp.f32 %v1654_v42 }
0x19bc   :  { %v3388_v48 = vpop.eup %3387 }
0x19bd   :  { %v3390_v45 = vpop.eup %3389  ;;  %v1669_v46 = vrot.slane %v3388_v48, 7 }
0x19be   :  { %v3392_v55 = vpop.eup %3391  ;;  %v1665_v47 = vsel %vm183_vm3, %v1664_v22, %v3390_v45 }
0x19bf   :  { %v1670_v49 = vsel %vm183_vm3, %v1669_v46, %v3392_v55 }
0x19c0   :  { %v1672_v50 = vsel %vm3626_vm4, %v1665_v47, %v1670_v49 }
0x19c1   :  { %1679 = vrot.lane.b32.xlu0 %v1672_v50, %s3535_s1  ;;  %v1677_v54 = vmul.f32 %v1675_v53, %v1672_v50 }
0x1a33   :  { %v1680_v51 = vpop.permute.xlu0 %1679 }
0x1a34   :  { %v1682_v52 = vmul.f32 %v1680_v51, %v1672_v50 }
0x1a36   :  { %1684 = vrot.lane.b32.xlu0 %v1682_v52, %s3540_s25 }
0x1aa8   :  { %v1685_v56 = vpop.permute.xlu0 %1684 }
0x1aa9   :  { %v1687_v57 = vadd.f32 %v1685_v56, %v1677_v54 }
0x1aab   :  { %3393 = vtanh.f32 %v1687_v57 }
0x1ab5   :  { %v3394_v58 = vpop.eup %3393 }
0x1ab6   :  { %1690 = vrot.lane.b32.xlu1 %v3394_v58, %s3535_s1 }
0x1b28   :  { %v1691_v60 = vpop.permute.xlu1 %1690 }
0x1b29   :  { %v3929_v61 = vmul.f32 %v1691_v60, %v1672_v50 }
0x1b2b   :  { %1735 = vrot.lane.b32.xlu0 %v3929_v61, %s3540_s25 }
0x1b9d   :  { %v1736_v62 = vpop.permute.xlu0 %1735 }
0x1b9e   :  { %3072 = vmatmul.mubr.msk.f32.vlgmr.msra.gmra.mrb[10].mxu0 %vm247_vm6, %v1736_v62 }
0x1b9f   :  { %3214 = vmatpush3.bf16.msra.mxu0 %v3897_v14  ;;  %3093 = vmatprep.mubr.msk.f32.mxu0 %vm3537_vm5, %v3538_v38 }
0x1ba0   :  { %3215 = vmatprep.subr.bf16.mxu0 %v3536_v35 }
0x1ba3   :  { %3217 = vmatpush3.bf16.msra.mxu0 %v3900_v17 }
0x1ba4   :  { %3224 = vmatprep.subr.bf16.mxu0 %v3536_v35 }
0x1c71   :  { %v1805_v0 = vpop.f32.mrb[10].mxu0 }
0x1c72   :  { %v1810_v1 = vrot.slane %v1805_v0, 1  ;;  %v1813_v36 = vadd.f32 %v1805_v0, %v1733_v63  ;;  %v3073_v2 = vpop.f32.mrb[11].mxu0 }
0x1c74   :  { %v1814_v4 = vadd.f32 %v1810_v1, %v1734_v3  ;;  %v2851_v59 = vmul.f32 -1.442695, %v1813_v36 }
0x1c76   :  { %3395 = vpow2.f32 %v2851_v59  ;;  %v2852_v39 = vmul.f32 -1.442695, %v1814_v4  ;;  %v2059_v59 = vld [vmem:[#allocation2 + $0x4] sm:$0x1] }
0x1c78   :  { %3397 = vpow2.f32 %v2852_v39 }
0x1c79   :  { %3399 = vtanh.f32 %v1814_v4 }
0x1c80   :  { %v3396_v5 = vpop.eup %3395 }
0x1c81   :  { %v1821_v6 = vadd.f32 1.0, %v3396_v5 }
0x1c82   :  { %v3398_v10 = vpop.eup %3397 }
0x1c83   :  { %v1822_v7 = vadd.f32 1.0, %v3398_v10  ;;  %v3400_v16 = vpop.eup %3399 }
0x1c84   :  { %v1831_v8 = vrot.slane %v3400_v16, 7 }
0x1c85   :  { %3401 = vrcp.f32 %v1822_v7  ;;  %v2060_v7 = vld [vmem:[#allocation2 + $0xc] sm:$0x1] }
0x1c86   :  { %3403 = vtanh.f32 %v1813_v36 }
0x1c87   :  { %3405 = vrcp.f32 %v1821_v6 }
0x1c8f   :  { %v3402_v9 = vpop.eup %3401 }
0x1c90   :  { %v3404_v11 = vpop.eup %3403  ;;  %v1836_v12 = vrot.slane %v3402_v9, 7 }
0x1c91   :  { %v3406_v23 = vpop.eup %3405  ;;  %v1832_v13 = vsel %vm183_vm3, %v1831_v8, %v3404_v11 }
0x1c92   :  { %v1837_v15 = vsel %vm183_vm3, %v1836_v12, %v3406_v23 }
0x1c93   :  { %v1839_v19 = vsel %vm3626_vm4, %v1832_v13, %v1837_v15 }
0x1c94   :  { %1842 = vrot.lane.b32.xlu1 %v1839_v19, %s3535_s1  ;;  %v1840_v26 = vmul.f32 %v1839_v19, %v1687_v57 }
0x1d06   :  { %v1843_v20 = vpop.permute.xlu1 %1842 }
0x1d07   :  { %v1845_v24 = vmul.f32 %v1843_v20, %v1839_v19 }
0x1d09   :  { %1847 = vrot.lane.b32.xlu0 %v1845_v24, %s3540_s25 }
0x1d7b   :  { %v1848_v27 = vpop.permute.xlu0 %1847 }
0x1d7c   :  { %v1850_v28 = vadd.f32 %v1848_v27, %v1840_v26 }
0x1d7e   :  { %3407 = vtanh.f32 %v1850_v28 }
0x1d88   :  { %v3408_v30 = vpop.eup %3407 }
0x1d89   :  { %1853 = vrot.lane.b32.xlu1 %v3408_v30, %s3535_s1 }
0x1dfb   :  { %v1854_v31 = vpop.permute.xlu1 %1853 }
0x1dfc   :  { %v3947_v33 = vmul.f32 %v1854_v31, %v1839_v19 }
0x1dfe   :  { %1898 = vrot.lane.b32.xlu0 %v3947_v33, %s3540_s25 }
0x1e70   :  { %v1899_v34 = vpop.permute.xlu0 %1898 }
0x1e71   :  { %3083 = vmatmul.mubr.msk.f32.vlgmr.msra.gmra.mrb[10].mxu1 %vm247_vm6, %v1899_v34 }
0x1e72   :  { %3220 = vmatpush3.bf16.msra.mxu1 %v3897_v14  ;;  %3104 = vmatprep.mubr.msk.f32.mxu1 %vm3537_vm5, %v3538_v38 }
0x1e73   :  { %3221 = vmatprep.subr.bf16.mxu1 %v3536_v35 }
0x1e76   :  { %3223 = vmatpush3.bf16.msra.mxu1 %v3900_v17 }
0x1e77   :  { %3230 = vmatprep.subr.bf16.mxu1 %v3536_v35 }
0x1f44   :  { %v1968_v40 = vpop.f32.mrb[10].mxu1 }
0x1f45   :  { %v1973_v18 = vrot.slane %v1968_v40, 1  ;;  %v1976_v41 = vadd.f32 %v1968_v40, %v1896_v37  ;;  %v3084_v42 = vpop.f32.mrb[11].mxu1 }
0x1f47   :  { %v1977_v44 = vadd.f32 %v1973_v18, %v1897_v43  ;;  %v2854_v22 = vmul.f32 -1.442695, %v1976_v41 }
0x1f49   :  { %3409 = vpow2.f32 %v2854_v22  ;;  %v2855_v48 = vmul.f32 -1.442695, %v1977_v44 }
0x1f4b   :  { %3411 = vpow2.f32 %v2855_v48  ;;  %v2222_v48 = vld [vmem:[#allocation2 + $0x5] sm:$0x1] }
0x1f4c   :  { %3413 = vtanh.f32 %v1977_v44 }
0x1f53   :  { %v3410_v45 = vpop.eup %3409 }
0x1f54   :  { %v1984_v55 = vadd.f32 1.0, %v3410_v45 }
0x1f55   :  { %v3412_v46 = vpop.eup %3411 }
0x1f56   :  { %v1985_v47 = vadd.f32 1.0, %v3412_v46  ;;  %v3414_v49 = vpop.eup %3413 }
0x1f57   :  { %v1994_v50 = vrot.slane %v3414_v49, 7  ;;  %v2223_v49 = vld [vmem:[#allocation2 + $0xd] sm:$0x1] }
0x1f58   :  { %3415 = vrcp.f32 %v1985_v47 }
0x1f59   :  { %3417 = vtanh.f32 %v1976_v41 }
0x1f5a   :  { %3419 = vrcp.f32 %v1984_v55 }
0x1f62   :  { %v3416_v51 = vpop.eup %3415 }
0x1f63   :  { %v3418_v52 = vpop.eup %3417  ;;  %v1999_v53 = vrot.slane %v3416_v51, 7 }
0x1f64   :  { %v3420_v54 = vpop.eup %3419  ;;  %v1995_v56 = vsel %vm183_vm3, %v1994_v50, %v3418_v52 }
0x1f65   :  { %v2000_v57 = vsel %vm183_vm3, %v1999_v53, %v3420_v54 }
0x1f66   :  { %v2002_v58 = vsel %vm3626_vm4, %v1995_v56, %v2000_v57 }
0x1f67   :  { %2005 = vrot.lane.b32.xlu1 %v2002_v58, %s3535_s1  ;;  %v2003_v63 = vmul.f32 %v2002_v58, %v1850_v28 }
0x1fd9   :  { %v2006_v60 = vpop.permute.xlu1 %2005 }
0x1fda   :  { %v2008_v62 = vmul.f32 %v2006_v60, %v2002_v58 }
0x1fdc   :  { %2010 = vrot.lane.b32.xlu0 %v2008_v62, %s3540_s25 }
0x204e   :  { %v2011_v0 = vpop.permute.xlu0 %2010 }
0x204f   :  { %v2013_v1 = vadd.f32 %v2011_v0, %v2003_v63 }
0x2051   :  { %3421 = vtanh.f32 %v2013_v1 }
0x205b   :  { %v3422_v36 = vpop.eup %3421 }
0x205c   :  { %2016 = vrot.lane.b32.xlu1 %v3422_v36, %s3535_s1 }
0x20ce   :  { %v2017_v2 = vpop.permute.xlu1 %2016 }
0x20cf   :  { %v3965_v3 = vmul.f32 %v2017_v2, %v2002_v58 }
0x20d1   :  { %2061 = vrot.lane.b32.xlu0 %v3965_v3, %s3540_s25 }
0x2143   :  { %v2062_v4 = vpop.permute.xlu0 %2061 }
0x2144   :  { %3094 = vmatmul.mubr.msk.f32.vlgmr.msra.gmra.mrb[12].mxu0 %vm247_vm6, %v2062_v4 }
0x2145   :  { %3226 = vmatpush3.bf16.msra.mxu0 %v3897_v14  ;;  %3115 = vmatprep.mubr.msk.f32.mxu0 %vm3537_vm5, %v3538_v38 }
0x2146   :  { %3227 = vmatprep.subr.bf16.mxu0 %v3536_v35 }
0x2149   :  { %3229 = vmatpush3.bf16.msra.mxu0 %v3900_v17 }
0x2217   :  { %v2131_v39 = vpop.f32.mrb[12].mxu0 }
0x2218   :  { %v2136_v5 = vrot.slane %v2131_v39, 1  ;;  %v2139_v10 = vadd.f32 %v2131_v39, %v2059_v59  ;;  %v3095_v6 = vpop.f32.mrb[13].mxu0 }
0x221a   :  { %v2140_v16 = vadd.f32 %v2136_v5, %v2060_v7  ;;  %v2857_v8 = vmul.f32 -1.442695, %v2139_v10  ;;  %v2385_v7 = vld [vmem:[#allocation2 + $0x6] sm:$0x1] }
0x221c   :  { %3423 = vpow2.f32 %v2857_v8  ;;  %v2858_v9 = vmul.f32 -1.442695, %v2140_v16 }
0x221e   :  { %3425 = vpow2.f32 %v2858_v9 }
0x221f   :  { %3427 = vtanh.f32 %v2140_v16 }
0x2226   :  { %v3424_v11 = vpop.eup %3423 }
0x2227   :  { %v2147_v23 = vadd.f32 1.0, %v3424_v11 }
0x2228   :  { %v3426_v12 = vpop.eup %3425 }
0x2229   :  { %v2148_v13 = vadd.f32 1.0, %v3426_v12  ;;  %v3428_v15 = vpop.eup %3427  ;;  %v2386_v12 = vld [vmem:[#allocation2 + $0xe] sm:$0x1] }
0x222a   :  { %v2157_v19 = vrot.slane %v3428_v15, 7 }
0x222b   :  { %3429 = vrcp.f32 %v2148_v13 }
0x222c   :  { %3431 = vtanh.f32 %v2139_v10 }
0x222d   :  { %3433 = vrcp.f32 %v2147_v23 }
0x2235   :  { %v3430_v20 = vpop.eup %3429 }
0x2236   :  { %v3432_v24 = vpop.eup %3431  ;;  %v2162_v26 = vrot.slane %v3430_v20, 7 }
0x2237   :  { %v3434_v27 = vpop.eup %3433  ;;  %v2158_v28 = vsel %vm183_vm3, %v2157_v19, %v3432_v24 }
0x2238   :  { %v2163_v30 = vsel %vm183_vm3, %v2162_v26, %v3434_v27 }
0x2239   :  { %v2165_v31 = vsel %vm3626_vm4, %v2158_v28, %v2163_v30 }
0x223a   :  { %2168 = vrot.lane.b32.xlu1 %v2165_v31, %s3535_s1  ;;  %v2166_v40 = vmul.f32 %v2165_v31, %v2013_v1 }
0x22ac   :  { %v2169_v34 = vpop.permute.xlu1 %2168 }
0x22ad   :  { %v2171_v37 = vmul.f32 %v2169_v34, %v2165_v31 }
0x22af   :  { %2173 = vrot.lane.b32.xlu0 %v2171_v37, %s3540_s25 }
0x2321   :  { %v2174_v18 = vpop.permute.xlu0 %2173 }
0x2322   :  { %v2176_v41 = vadd.f32 %v2174_v18, %v2166_v40 }
0x2324   :  { %3435 = vtanh.f32 %v2176_v41 }
0x232e   :  { %v3436_v42 = vpop.eup %3435 }
0x232f   :  { %2179 = vrot.lane.b32.xlu1 %v3436_v42, %s3535_s1 }
0x23a1   :  { %v2180_v43 = vpop.permute.xlu1 %2179 }
0x23a2   :  { %v3982_v44 = vmul.f32 %v2180_v43, %v2165_v31 }
0x23a4   :  { %2224 = vrot.lane.b32.xlu0 %v3982_v44, %s3540_s25 }
0x2416   :  { %v2225_v22 = vpop.permute.xlu0 %2224 }
0x2417   :  { %3105 = vmatmul.mubr.msk.f32.vlgmr.msra.gmra.mrb[12].mxu1 %vm247_vm6, %v2225_v22 }
0x2418   :  { %3232 = vmatpush3.bf16.msra.mxu1 %v3897_v14  ;;  %3126 = vmatprep.mubr.msk.f32.mxu1 %vm3537_vm5, %v3538_v38 }
0x2419   :  { %3233 = vmatprep.subr.bf16.mxu1 %v3536_v35 }
0x241c   :  { %3235 = vmatpush3.bf16.msra.mxu1 %v3900_v17 }
0x24ea   :  { %v2294_v45 = vpop.f32.mrb[12].mxu1 }
0x24eb   :  { %v2299_v46 = vrot.slane %v2294_v45, 1  ;;  %v2302_v55 = vadd.f32 %v2294_v45, %v2222_v48  ;;  %v3106_v47 = vpop.f32.mrb[13].mxu1 }
0x24ed   :  { %v2303_v50 = vadd.f32 %v2299_v46, %v2223_v49  ;;  %v2860_v51 = vmul.f32 -1.442695, %v2302_v55 }
0x24ef   :  { %3437 = vpow2.f32 %v2860_v51  ;;  %v2861_v52 = vmul.f32 -1.442695, %v2303_v50 }
0x24f1   :  { %3439 = vpow2.f32 %v2861_v52 }
0x24f2   :  { %3441 = vtanh.f32 %v2303_v50  ;;  %v2548_v50 = vld [vmem:[#allocation2 + $0x7] sm:$0x1] }
0x24f9   :  { %v3438_v53 = vpop.eup %3437 }
0x24fa   :  { %v2310_v54 = vadd.f32 1.0, %v3438_v53 }
0x24fb   :  { %v3440_v14 = vpop.eup %3439 }
0x24fc   :  { %v2311_v38 = vadd.f32 1.0, %v3440_v14  ;;  %v3442_v35 = vpop.eup %3441 }
0x24fd   :  { %v2320_v17 = vrot.slane %v3442_v35, 7 }
0x24fe   :  { %3443 = vrcp.f32 %v2311_v38 }
0x24ff   :  { %3445 = vtanh.f32 %v2302_v55 }
0x2500   :  { %3447 = vrcp.f32 %v2310_v54  ;;  %v2549_v54 = vld [vmem:[#allocation2 + $0xf] sm:$0x1] }
0x2508   :  { %v3444_v56 = vpop.eup %3443 }
0x2509   :  { %v3446_v57 = vpop.eup %3445  ;;  %v2325_v58 = vrot.slane %v3444_v56, 7 }
0x250a   :  { %v3448_v60 = vpop.eup %3447  ;;  %v2321_v62 = vsel %vm183_vm3, %v2320_v17, %v3446_v57 }
0x250b   :  { %v2326_v63 = vsel %vm183_vm3, %v2325_v58, %v3448_v60 }
0x250c   :  { %v2328_v0 = vsel %vm3626_vm4, %v2321_v62, %v2326_v63 }
0x250d   :  { %2331 = vrot.lane.b32.xlu1 %v2328_v0, %s3535_s1  ;;  %v2329_v2 = vmul.f32 %v2328_v0, %v2176_v41 }
0x257f   :  { %v2332_v1 = vpop.permute.xlu1 %2331 }
0x2580   :  { %v2334_v36 = vmul.f32 %v2332_v1, %v2328_v0 }
0x2582   :  { %2336 = vrot.lane.b32.xlu0 %v2334_v36, %s3540_s25 }
0x25f4   :  { %v2337_v4 = vpop.permute.xlu0 %2336 }
0x25f5   :  { %v2339_v59 = vadd.f32 %v2337_v4, %v2329_v2 }
0x25f7   :  { %3449 = vtanh.f32 %v2339_v59 }
0x2601   :  { %v3450_v39 = vpop.eup %3449 }
0x2602   :  { %2342 = vrot.lane.b32.xlu1 %v3450_v39, %s3535_s1 }
0x2674   :  { %v2343_v5 = vpop.permute.xlu1 %2342 }
0x2675   :  { %v3999_v10 = vmul.f32 %v2343_v5, %v2328_v0  ;;  %v1534_v5 = vrot.slane %v3910_v21, %v3784_v29 }
0x2677   :  { %2387 = vrot.lane.b32.xlu0 %v3999_v10, %s3540_s25 }
0x26e9   :  { %v2388_v6 = vpop.permute.xlu0 %2387 }
0x26ea   :  { %3116 = vmatmul.mubr.msk.f32.vlgmr.msra.gmra.mrb[14].mxu0 %vm247_vm6, %v2388_v6 }
0x27bd   :  { %v2457_v16 = vpop.f32.mrb[14].mxu0 }
0x27be   :  { %v2462_v8 = vrot.slane %v2457_v16, 1  ;;  %v2465_v9 = vadd.f32 %v2457_v16, %v2385_v7  ;;  %v3117_v11 = vpop.f32.mrb[15].mxu0  ;;  %v1542_v7 = vrot.slane %v1534_v5, %v3784_v29  ;;  %v1864_v16 = vrot.slane %v3947_v33, %v3784_v29 }
0x27bf   :  { %v1535_v33 = vcombine.high %v1534_v5, %v1534_v5 }
0x27c0   :  { %v2466_v23 = vadd.f32 %v2462_v8, %v2386_v12  ;;  %v2863_v13 = vmul.f32 -1.442695, %v2465_v9  ;;  %v1872_v25 = vrot.slane %v1864_v16, %v3784_v29  ;;  %v1553_v11 = vrot.slane %v1542_v7, %v3788_v32 }
0x27c2   :  { %3451 = vpow2.f32 %v2863_v13  ;;  %v2864_v15 = vmul.f32 -1.442695, %v2466_v23 }
0x27c4   :  { %3453 = vpow2.f32 %v2864_v15 }
0x27c5   :  { %3455 = vtanh.f32 %v2466_v23  ;;  %v1883_v23 = vrot.slane %v1872_v25, %v3788_v32 }
0x27cc   :  { %v3452_v19 = vpop.eup %3451 }
0x27cd   :  { %v2473_v24 = vadd.f32 1.0, %v3452_v19 }
0x27ce   :  { %v3454_v20 = vpop.eup %3453 }
0x27cf   :  { %v2474_v26 = vadd.f32 1.0, %v3454_v20  ;;  %v3456_v27 = vpop.eup %3455  ;;  %v1549_v20 = vrot.slane %v1535_v33, %v3784_v29 }
0x27d0   :  { %v2483_v28 = vrot.slane %v3456_v27, 7 }
0x27d1   :  { %3457 = vrcp.f32 %v2474_v26  ;;  %v1557_v26 = vrot.slane %v1549_v20, %v3788_v32  ;;  %v2868_v20 = vld [vmem:[%s4139_s8] ss:$0 sm:$0xff] }
0x27d2   :  { %3459 = vtanh.f32 %v2465_v9  ;;  %v2190_v9 = vrot.slane %v3982_v44, %v3784_v29  ;;  %v1865_v44 = vcombine.high %v1864_v16, %v1864_v16 }
0x27d3   :  { %3461 = vrcp.f32 %v2473_v24 }
0x27d4   :  { %v2198_v21 = vrot.slane %v2190_v9, %v3784_v29  ;;  %v2191_v24 = vcombine.high %v2190_v9, %v2190_v9  ;;  %v1879_v27 = vrot.slane %v1865_v44, %v3784_v29 }
0x27d6   :  { %v2209_v15 = vrot.slane %v2198_v21, %v3788_v32 }
0x27db   :  { %v3458_v30 = vpop.eup %3457 }
0x27dc   :  { %v3460_v31 = vpop.eup %3459  ;;  %v2488_v34 = vrot.slane %v3458_v30, 7  ;;  %v1887_v30 = vrot.slane %v1879_v27, %v3788_v32 }
0x27dd   :  { %v3462_v37 = vpop.eup %3461  ;;  %v2484_v40 = vsel %vm183_vm3, %v2483_v28, %v3460_v31  ;;  %v2205_v31 = vrot.slane %v2191_v24, %v3784_v29 }
0x27de   :  { %v2489_v18 = vsel %vm183_vm3, %v2488_v34, %v3462_v37 }
0x27df   :  { %v2491_v41 = vsel %vm3626_vm4, %v2484_v40, %v2489_v18  ;;  %v2213_v34 = vrot.slane %v2205_v31, %v3788_v32 }
0x27e0   :  { %2494 = vrot.lane.b32.xlu1 %v2491_v41, %s3535_s1  ;;  %v2492_v22 = vmul.f32 %v2491_v41, %v2339_v59 }
0x2852   :  { %v2495_v42 = vpop.permute.xlu1 %2494 }
0x2853   :  { %v2497_v43 = vmul.f32 %v2495_v42, %v2491_v41 }
0x2855   :  { %2499 = vrot.lane.b32.xlu0 %v2497_v43, %s3540_s25 }
0x28c7   :  { %v2500_v48 = vpop.permute.xlu0 %2499 }
0x28c8   :  { %v4010_v45 = vadd.f32 %v2500_v48, %v2492_v22  ;;  %v1701_v22 = vrot.slane %v3929_v61, %v3784_v29 }
0x28ca   :  { %3463 = vtanh.f32 %v4010_v45 }
0x28d4   :  { %v3464_v46 = vpop.eup %3463 }
0x28d5   :  { %2505 = vrot.lane.b32.xlu1 %v3464_v46, %s3535_s1  ;;  %v1709_v46 = vrot.slane %v1701_v22, %v3784_v29 }
0x2947   :  { %v2506_v55 = vpop.permute.xlu1 %2505 }
0x2948   :  { %v2508_v47 = vmul.f32 %v2506_v55, %v2491_v41  ;;  %v2027_v55 = vrot.slane %v3965_v3, %v3784_v29 }
0x294a   :  { %2550 = vrot.lane.b32.xlu0 %v2508_v47, %s3540_s25  ;;  %v2516_v12 = vrot.slane %v2508_v47, %v3784_v29 }
0x294c   :  { %v2524_v13 = vrot.slane %v2516_v12, %v3784_v29  ;;  %v2517_v28 = vcombine.high %v2516_v12, %v2516_v12 }
0x294e   :  { %v2535_v19 = vrot.slane %v2524_v13, %v3788_v32  ;;  %v2531_v37 = vrot.slane %v2517_v28, %v3784_v29 }
0x2950   :  { %v2539_v40 = vrot.slane %v2531_v37, %v3788_v32 }
0x29bc   :  { %v2551_v49 = vpop.permute.xlu0 %2550 }
0x29bd   :  { %3127 = vmatmul.mubr.msk.f32.vlgmr.msra.gmra.mrb[14].mxu1 %vm247_vm6, %v2551_v49 }
0x2a90   :  { %v2620_v51 = vpop.f32.mrb[14].mxu1 }
0x2a91   :  { %v2625_v52 = vrot.slane %v2620_v51, 1  ;;  %v2628_v53 = vadd.f32 %v2620_v51, %v2548_v50  ;;  %v3128_v14 = vpop.f32.mrb[15].mxu1  ;;  %v2353_v50 = vrot.slane %v3999_v10, %v3784_v29  ;;  %v1720_v51 = vrot.slane %v1709_v46, %v3788_v32 }
0x2a93   :  { %v2629_v38 = vadd.f32 %v2625_v52, %v2549_v54  ;;  %v2866_v35 = vmul.f32 -1.442695, %v2628_v53  ;;  %v1702_v52 = vcombine.high %v1701_v22, %v1701_v22  ;;  %v2361_v3 = vrot.slane %v2353_v50, %v3784_v29 }
0x2a94   :  { %v2028_v54 = vcombine.high %v2027_v55, %v2027_v55 }
0x2a95   :  { %3465 = vpow2.f32 %v2866_v35  ;;  %v2867_v17 = vmul.f32 -1.442695, %v2629_v38  ;;  %v2372_v10 = vrot.slane %v2361_v3, %v3788_v32  ;;  %v1716_v35 = vrot.slane %v1702_v52, %v3784_v29 }
0x2a97   :  { %3467 = vpow2.f32 %v2867_v17  ;;  %v2354_v17 = vcombine.high %v2353_v50, %v2353_v50 }
0x2a98   :  { %3469 = vtanh.f32 %v2629_v38 }
0x2a9f   :  { %v3466_v56 = vpop.eup %3465 }
0x2aa0   :  { %v2636_v58 = vadd.f32 1.0, %v3466_v56 }
0x2aa1   :  { %v3468_v57 = vpop.eup %3467 }
0x2aa2   :  { %v2637_v60 = vadd.f32 1.0, %v3468_v57  ;;  %v3470_v62 = vpop.eup %3469  ;;  %v1724_v57 = vrot.slane %v1716_v35, %v3788_v32 }
0x2aa3   :  { %v2646_v63 = vrot.slane %v3470_v62, 7 }
0x2aa4   :  { %3471 = vrcp.f32 %v2637_v60 }
0x2aa5   :  { %3473 = vtanh.f32 %v2628_v53 }
0x2aa6   :  { %3475 = vrcp.f32 %v2636_v58  ;;  %v2042_v58 = vrot.slane %v2028_v54, %v3784_v29 }
0x2aa8   :  { %v2050_v62 = vrot.slane %v2042_v58, %v3788_v32 }
0x2aae   :  { %v3472_v0 = vpop.eup %3471 }
0x2aaf   :  { %v3474_v1 = vpop.eup %3473  ;;  %v2651_v36 = vrot.slane %v3472_v0, 7 }
0x2ab0   :  { %v3476_v2 = vpop.eup %3475  ;;  %v2647_v4 = vsel %vm183_vm3, %v2646_v63, %v3474_v1  ;;  %v2368_v63 = vrot.slane %v2354_v17, %v3784_v29 }
0x2ab1   :  { %v2652_v59 = vsel %vm183_vm3, %v2651_v36, %v3476_v2  ;;  %v2711_v36 = vld [vmem:[%s4138_s7] sm:$0xff]  ;;  %v2712_v2 = vld [vmem:[%s4138_s7 + $0x8] sm:$0xff] }
0x2ab2   :  { %v4020_v39 = vsel %vm3626_vm4, %v2647_v4, %v2652_v59  ;;  %v2376_v0 = vrot.slane %v2368_v63, %v3788_v32  ;;  %v2713_v4 = vld [vmem:[%s4138_s7 + $0x10] sm:$0xff]  ;;  %v3236_v5 = vpack.c.bf16 %v2712_v2, %v2711_v36 }
0x2ab3   :  { %2657 = vrot.lane.b32.xlu1 %v4020_v39, %s3535_s1  ;;  %v2655_v18 = vmul.f32 %v4020_v39, %v4010_v45  ;;  %v2035_v45 = vrot.slane %v2027_v55, %v3784_v29 }
0x2ab4   :  { %3237 = vmatprep.subr.bf16.mxu0 %v3236_v5 }
0x2ab5   :  { %v2046_v14 = vrot.slane %v2035_v45, %v3788_v32  ;;  %3239 = vmatpush3.bf16.msra.mxu0 %v3236_v5 }
0x2b25   :  { %v2658_v6 = vpop.permute.xlu1 %2657 }
0x2b26   :  { %v2660_v8 = vmul.f32 %v2658_v6, %v4020_v39  ;;  %v2714_v6 = vld [vmem:[%s4138_s7 + $0x18] sm:$0xff] }
0x2b27   :  { %v3240_v7 = vpack.c.bf16 %v2714_v6, %v2713_v4 }
0x2b28   :  { %2662 = vrot.lane.b32.xlu0 %v2660_v8, %s3540_s25 }
0x2b29   :  { %3241 = vmatprep.subr.bf16.mxu0 %v3240_v7 }
0x2b2a   :  { %3243 = vmatpush3.bf16.msra.mxu0 %v3240_v7 }
0x2b2c   :  { %1558 = vrot.lane.b32.xlu0 %v1553_v11, %s3540_s25 }
0x2b30   :  { %1888 = vrot.lane.b32.xlu0 %v1883_v23, %s3540_s25 }
0x2b34   :  { %2214 = vrot.lane.b32.xlu0 %v2209_v15, %s3540_s25 }
0x2b38   :  { %2540 = vrot.lane.b32.xlu0 %v2535_v19, %s3540_s25 }
0x2b3c   :  { %1560 = vrot.lane.b32.xlu0 %v1557_v26, %s3540_s25 }
0x2b40   :  { %1890 = vrot.lane.b32.xlu0 %v1887_v30, %s3540_s25 }
0x2b44   :  { %2216 = vrot.lane.b32.xlu0 %v2213_v34, %s3540_s25 }
0x2b48   :  { %2542 = vrot.lane.b32.xlu0 %v2539_v40, %s3540_s25 }
0x2b9a   :  { %v2663_v41 = vpop.permute.xlu0 %2662 }
0x2b9b   :  { %v2665_v42 = vadd.f32 %v2663_v41, %v2655_v18 }
0x2b9d   :  { %3477 = vtanh.f32 %v2665_v42 }
0x2b9e   :  { %v1559_v43 = vpop.permute.xlu0 %1558 }
0x2b9f   :  { %1564 = vst.msk [vmem:[#allocation3] sm:$0x1] %vm240_vm7, %v1559_v43 }
0x2ba2   :  { %v1889_v48 = vpop.permute.xlu0 %1888 }
0x2ba3   :  { %1894 = vst.msk [vmem:[#allocation3 + $0x2] sm:$0x1] %vm240_vm7, %v1889_v48 }
0x2ba6   :  { %v2215_v47 = vpop.permute.xlu0 %2214 }
0x2ba7   :  { %v3478_v49 = vpop.eup %3477  ;;  %2220 = vst.msk [vmem:[#allocation3 + $0x4] sm:$0x1] %vm240_vm7, %v2215_v47 }
0x2ba8   :  { %2668 = vrot.lane.b32.xlu1 %v3478_v49, %s3535_s1 }
0x2baa   :  { %v2541_v61 = vpop.permute.xlu0 %2540 }
0x2bab   :  { %2546 = vst.msk [vmem:[#allocation3 + $0x6] sm:$0x1] %vm240_vm7, %v2541_v61 }
0x2bac   :  { %1725 = vrot.lane.b32.xlu1 %v1720_v51, %s3540_s25 }
0x2bae   :  { %v1561_v53 = vpop.permute.xlu0 %1560 }
0x2baf   :  { %1565 = vst.msk [vmem:[#allocation3 + $0x8] sm:$0x1] %vm240_vm7, %v1561_v53 }
0x2bb0   :  { %2051 = vrot.lane.b32.xlu1 %v2046_v14, %s3540_s25 }
0x2bb2   :  { %v1891_v38 = vpop.permute.xlu0 %1890 }
0x2bb3   :  { %1895 = vst.msk [vmem:[#allocation3 + $0xa] sm:$0x1] %vm240_vm7, %v1891_v38 }
0x2bb4   :  { %2377 = vrot.lane.b32.xlu1 %v2372_v10, %s3540_s25 }
0x2bb6   :  { %v2217_v56 = vpop.permute.xlu0 %2216 }
0x2bb7   :  { %2221 = vst.msk [vmem:[#allocation3 + $0xc] sm:$0x1] %vm240_vm7, %v2217_v56 }
0x2bb8   :  { %1727 = vrot.lane.b32.xlu1 %v1724_v57, %s3540_s25 }
0x2bba   :  { %v2543_v60 = vpop.permute.xlu0 %2542 }
0x2bbb   :  { %2547 = vst.msk [vmem:[#allocation3 + $0xe] sm:$0x1] %vm240_vm7, %v2543_v60 }
0x2bbc   :  { %2053 = vrot.lane.b32.xlu1 %v2050_v62, %s3540_s25 }
0x2bc0   :  { %2379 = vrot.lane.b32.xlu1 %v2376_v0, %s3540_s25 }
0x2c1a   :  { %v2669_v1 = vpop.permute.xlu1 %2668 }
0x2c1b   :  { %v2671_v59 = vmul.f32 %v2669_v1, %v4020_v39 }
0x2c1d   :  { %v2679_v16 = vrot.slane %v2671_v59, %v3784_v29 }
0x2c1e   :  { %v1726_v8 = vpop.permute.xlu1 %1725 }
0x2c1f   :  { %v2680_v25 = vcombine.high %v2679_v16, %v2679_v16  ;;  %v2687_v9 = vrot.slane %v2679_v16, %v3784_v29  ;;  %1731 = vst.msk [vmem:[#allocation3 + $0x1] sm:$0x1] %vm240_vm7, %v1726_v8 }
0x2c21   :  { %v2698_v11 = vrot.slane %v2687_v9, %v3788_v32  ;;  %v2694_v39 = vrot.slane %v2680_v25, %v3784_v29 }
0x2c22   :  { %v2052_v21 = vpop.permute.xlu1 %2051 }
0x2c23   :  { %2057 = vst.msk [vmem:[#allocation3 + $0x3] sm:$0x1] %vm240_vm7, %v2052_v21  ;;  %2703 = vrot.lane.b32.xlu1 %v2698_v11, %s3540_s25  ;;  %v2702_v12 = vrot.slane %v2694_v39, %v3788_v32 }
0x2c26   :  { %v2378_v23 = vpop.permute.xlu1 %2377 }
0x2c27   :  { %2383 = vst.msk [vmem:[#allocation3 + $0x5] sm:$0x1] %vm240_vm7, %v2378_v23  ;;  %2705 = vrot.lane.b32.xlu1 %v2702_v12, %s3540_s25 }
0x2c2a   :  { %v1728_v33 = vpop.permute.xlu1 %1727 }
0x2c2b   :  { %1732 = vst.msk [vmem:[#allocation3 + $0x9] sm:$0x1] %vm240_vm7, %v1728_v33 }
0x2c2e   :  { %v2054_v13 = vpop.permute.xlu1 %2053 }
0x2c2f   :  { %2058 = vst.msk [vmem:[#allocation3 + $0xb] sm:$0x1] %vm240_vm7, %v2054_v13 }
0x2c32   :  { %v2380_v29 = vpop.permute.xlu1 %2379 }
0x2c33   :  { %2384 = vst.msk [vmem:[#allocation3 + $0xd] sm:$0x1] %vm240_vm7, %v2380_v29 }
0x2c95   :  { %v2704_v15 = vpop.permute.xlu1 %2703 }
0x2c96   :  { %2709 = vst.msk [vmem:[#allocation3 + $0x7] sm:$0x1] %vm240_vm7, %v2704_v15 }
0x2c99   :  { %v2706_v44 = vpop.permute.xlu1 %2705 }
0x2c9a   :  { %2710 = vst.msk [vmem:[#allocation3 + $0xf] sm:$0x1] %vm240_vm7, %v2706_v44 }
0x2c9d   :  { %v2716_v32 = vld [vmem:[#allocation3] sm:$0xff] }
0x2c9e   :  { %3137 = vmatprep.mubr.msk.f32.mxu0 %vm247_vm6, %v2716_v32 }
0x2ca1   :  { %v2717_v19 = vld [vmem:[#allocation3 + $0x8] sm:$0xff] }
0x2ca2   :  { %3138 = vmatmul.mubr.msk.f32.vlgmr.msra.gmra.mrb[16].mxu0 %vm247_vm6, %v2717_v19 }
0x2d75   :  { %v3139_v24 = vpop.f32.mrb[16].mxu0 }
0x2d76   :  { %v2802_v26 = vadd.f32 %v3139_v24, %v2868_v20  ;;  %v2796_v27 = vpop.f32.mrb[17].mxu0 }
0x2d77   :  { %v2797_v28 = vadd.f32 %v2868_v20, %v2796_v27 }
0x2d78   :  { %3479 = vtanh.f32 %v2802_v26 }
0x2d79   :  { %3481 = vtanh.f32 %v2797_v28 }
0x2d82   :  { %v3480_v30 = vpop.eup %3479 }
0x2d83   :  { %v3482_v31 = vpop.eup %3481  ;;  %2809 = vst.msk [vmem:[%s4140_s9 + $0x8] sm:$0xff] %vm2807_vm8, %v3480_v30 }
0x2d84   :  { %2808 = vst.msk [vmem:[%s4140_s9] sm:$0xff] %vm2807_vm8, %v3482_v31 }
0x2d85   :  { %2814 = vsyncpa [#allocation5], 1 }
0x2d86   :  { %2815 = vsyncpa [#allocation7], 1 }

</bundles_post_ra>
